<compile_context>
chip_gen: v7x
topology: tpu7x:2x2x1
jax: 0.10.0
libtpu: 0.0.40
codegen_flags: <defaults>
</compile_context>

<pallas_src>
import functools

import jax
import jax.numpy as jnp
from jax.experimental import pallas as pl
from jax.experimental.pallas import tpu as pltpu


# ----------------------------- hardware helpers -----------------------------


def _vmem_limit_bytes():
    """Explicit scoped-VMEM limit: ~85% of physical (64 MiB v7x / 128 MiB v5e,v6e)."""
    try:
        info = pltpu.get_tpu_info()
        cap = getattr(info, "vmem_capacity_bytes", None)
        if cap:
            return int(cap * 0.85)
    except Exception:
        pass
    return 56 * 1024 * 1024          # conservative fallback, safe on all parts


def _default_batch_shards(batch):
    """Use both TensorCores on 2-core chips (v7x) by sharding the batch."""
    try:
        kind = jax.devices()[0].device_kind.lower()
    except Exception:
        return 1
    if "v7" in kind and batch % 2 == 0:
        return 2
    return 1


def _divisor_tile(n, target):
    t = min(n, target)
    while n % t:
        t -= 1
    return t


# ------------------------- fused transformer stack --------------------------


def _gpt2_stack_kernel(
    h0_ref, bias_ref,
    ln1_g_ref, ln1_b_ref, wqkvT_ref, bqkvT_ref, wo_ref, bo_ref,
    ln2_g_ref, ln2_b_ref, w1_ref, b1_ref, w2_ref, b2_ref,
    lnf_g_ref, lnf_b_ref,
    hf_ref,
    h_scr, qkvT_scr, attnT_scr,
    *, num_heads, eps, matmul_dtype):
    layer = pl.program_id(1)

    # Load this shard's initial activations into the resident accumulator once.
    @pl.when(layer == 0)
    def _():
        h_scr[...] = h0_ref[...].astype(jnp.float32)

    h = h_scr[...]                          # (Ns, D) f32, batch-major rows
    Ns, D = h.shape
    dh = D // num_heads

    def layer_norm(x, g, b):
        mu = jnp.mean(x, axis=-1, keepdims=True)
        var = jnp.mean(jnp.square(x - mu), axis=-1, keepdims=True)
        return (x - mu) * jax.lax.rsqrt(var + eps) * g + b

    def mm(x, w):
        # bf16 MXU inputs (weights are already bf16 in HBM), f32 accumulation.
        return jax.lax.dot_general(
            x.astype(matmul_dtype), w, (((x.ndim - 1,), (0,)), ((), ())),
            preferred_element_type=jnp.float32)

    # ----------------- attention (PyTorch Block semantics) ------------------
    # x = ln_1(h); residual below is taken from x (as in the reference code).
    x = layer_norm(h, ln1_g_ref[0], ln1_b_ref[0])
    x_bf = x.astype(matmul_dtype)

    # Fused QKV in feature-major layout: qkv^T = Wqkv^T @ x^T  -> (3D, Ns).
    # Per-head slices are then sublane slices (128-lane clean), bias per-row.
    # The 1/sqrt(dh) scale is folded into the Q weights/bias at init time.
    qkvT = jax.lax.dot_general(
        wqkvT_ref[0], x_bf, (((1,), (1,)), ((), ())),
        preferred_element_type=jnp.float32)
    qkvT_scr[...] = qkvT + bqkvT_ref[0]

    bias = bias_ref[...]                    # additive mask (0 / -1e30), f32

    @pl.loop(0, num_heads)                  # bounded live ranges per head
    def _(hh):
        off = pl.multiple_of(hh * dh, dh)
        qT = qkvT_scr[pl.ds(off, dh), :].astype(matmul_dtype)           # (dh, Ns)
        kT = qkvT_scr[pl.ds(D + off, dh), :].astype(matmul_dtype)       # (dh, Ns)
        vT = qkvT_scr[pl.ds(2 * D + off, dh), :].astype(matmul_dtype)   # (dh, Ns)
        # s[i, j] = q_i . k_j   (bf16 MXU, f32 accumulation)
        s = jax.lax.dot_general(qT, kT, (((0,), (0,)), ((), ())),
                                preferred_element_type=jnp.float32)      # (Nq, Nk)
        s = s + bias
        s = s - jnp.max(s, axis=-1, keepdims=True)
        p = jnp.exp(s)
        p = p * pl.reciprocal(jnp.sum(p, axis=-1, keepdims=True), approx=True)
        # o^T[d, i] = sum_j v^T[d, j] * p[i, j]
        oT = jax.lax.dot_general(vT, p.astype(matmul_dtype),
                                 (((1,), (1,)), ((), ())),
                                 preferred_element_type=jnp.float32)     # (dh, Ns)
        attnT_scr[pl.ds(off, dh), :] = oT    # head-concat along features

    # Single output projection with full K = D (instead of num_heads K=dh ones).
    a = jax.lax.dot_general(
        attnT_scr[...].astype(matmul_dtype), wo_ref[0],
        (((0,), (0,)), ((), ())), preferred_element_type=jnp.float32)    # (Ns, D)
    a = a + bo_ref[0]

    x = x + a                                # residual from ln_1 output

    # ------------------------------- MLP ------------------------------------
    m = layer_norm(x, ln2_g_ref[0], ln2_b_ref[0])
    m = mm(m, w1_ref[0]) + b1_ref[0]                                     # (Ns, 4D)
    m = 0.5 * m * (1.0 + jax.lax.erf(m * 0.7071067811865476))           # exact GELU
    m = mm(m, w2_ref[0]) + b2_ref[0]                                     # (Ns, D)

    h_new = x + m
    h_scr[...] = h_new

    # -------- final LayerNorm fused into the last grid step epilogue --------
    @pl.when(layer == pl.num_programs(1) - 1)
    def _():
        hf_ref[...] = layer_norm(h_new, lnf_g_ref[...],
                                 lnf_b_ref[...]).astype(hf_ref.dtype)


def gpt2_stack(h0, bias, params, *, num_heads, batch_shards=1, eps=1e-5):
    N, D = h0.shape
    Ns = N // batch_shards
    nlayers = params["wqkvT"].shape[0]
    H4 = params["w1"].shape[2]

    def per_layer(shape):
        zeros = (0,) * len(shape)
        return pl.BlockSpec((1,) + shape, lambda p, l, z=zeros: (l,) + z)

    def shared(shape):
        zeros = (0,) * len(shape)
        return pl.BlockSpec(shape, lambda p, l, z=zeros: z)

    def sharded(shape):
        zeros = (0,) * (len(shape) - 1)
        return pl.BlockSpec(shape, lambda p, l, z=zeros: (p,) + z)

    kernel = functools.partial(_gpt2_stack_kernel, num_heads=num_heads,
                               eps=eps, matmul_dtype=jnp.bfloat16)

    return pl.pallas_call(
        kernel,
        out_shape=jax.ShapeDtypeStruct((N, D), jnp.float32),
        grid=(batch_shards, nlayers),
        in_specs=[
            sharded((Ns, D)),                              # h0
            shared((Ns, Ns)),                              # additive attn bias
            per_layer((1, D)), per_layer((1, D)),          # ln1 gamma / beta
            per_layer((3 * D, D)), per_layer((3 * D, 1)),  # QKV^T w / b (bf16 w)
            per_layer((D, D)), per_layer((1, D)),          # out-proj w / b
            per_layer((1, D)), per_layer((1, D)),          # ln2 gamma / beta
            per_layer((D, H4)), per_layer((1, H4)),        # MLP up w / b
            per_layer((H4, D)), per_layer((1, D)),         # MLP down w / b
            shared((1, D)), shared((1, D)),                # final LN gamma / beta
        ],
        out_specs=pl.BlockSpec((Ns, D), lambda p, l: (p, 0)),
        scratch_shapes=[pltpu.VMEM((Ns, D), jnp.float32),       # resident h
                        pltpu.VMEM((3 * D, Ns), jnp.float32),   # qkv^T
                        pltpu.VMEM((D, Ns), jnp.float32)],      # head concat^T
        compiler_params=pltpu.CompilerParams(
            dimension_semantics=("parallel", "arbitrary"),
            vmem_limit_bytes=_vmem_limit_bytes()),
    )(h0, bias,
      params["ln1_g"], params["ln1_b"], params["wqkvT"], params["bqkvT"],
      params["wo"], params["bo"], params["ln2_g"], params["ln2_b"],
      params["w1"], params["b1"], params["w2"], params["b2"],
      params["lnf_g"], params["lnf_b"])


# ------------------------------ LM head kernel -------------------------------


def _lm_head_kernel(hf_ref, w_ref, out_ref):
    out_ref[...] = jax.lax.dot_general(
        hf_ref[...].astype(w_ref.dtype), w_ref[...], (((1,), (0,)), ((), ())),
        preferred_element_type=jnp.float32)


def lm_head(hf, head_w, *, row_tile=256, vocab_tile=512):
    N, D = hf.shape
    Vp = head_w.shape[1]
    tn = _divisor_tile(N, row_tile)
    tv = _divisor_tile(Vp, vocab_tile)
    return pl.pallas_call(
        _lm_head_kernel,
        out_shape=jax.ShapeDtypeStruct((N, Vp), jnp.float32),
        grid=(N // tn, Vp // tv),
        in_specs=[pl.BlockSpec((tn, D), lambda i, j: (i, 0)),
                  pl.BlockSpec((D, tv), lambda i, j: (0, j))],
        out_specs=pl.BlockSpec((tn, tv), lambda i, j: (i, j)),
        compiler_params=pltpu.CompilerParams(
            dimension_semantics=("parallel", "parallel"),
            vmem_limit_bytes=_vmem_limit_bytes()),
    )(hf, head_w)


# ------------------------------ model (glue) --------------------------------


def gpt2_forward(tokens, params, config, *, batch_shards=None):
    # tokens: (L, B) int32 -- seq-major, matching the PyTorch forward.
    L, B = tokens.shape
    D = config["embedding_dim"]
    V = config["vocab_size"]
    N = L * B

    if batch_shards is None:
        batch_shards = _default_batch_shards(B)
    if B % batch_shards != 0 or (N // batch_shards) % 8 != 0:
        batch_shards = 1

    # Embedding gathers / sos shift stay as XLA glue (no clean Pallas gather).
    tok_emb = params["token_emb"][tokens]                        # (L, B, D)
    sos = jnp.ones((1, B, D), jnp.float32) * params["sos"]       # (1, B, D)
    h = jnp.concatenate([sos, tok_emb[:-1]], axis=0)             # shift right
    h = h + params["pos_emb"][:L][:, None, :]                    # + positions
    # Batch-major flatten so a batch shard owns contiguous rows.
    h0 = jnp.transpose(h, (1, 0, 2)).reshape(N, D).astype(jnp.float32)

    # Additive causal + batch-separation bias for one shard (0 / -1e30); it is
    # identical for every shard, so only (Ns, Ns) is built and stays resident.
    Ns = N // batch_shards
    r = jnp.arange(Ns, dtype=jnp.int32)
    seq = r % L
    bat = r // L
    allowed = (bat[:, None] == bat[None, :]) & (seq[None, :] <= seq[:, None])
    bias = jnp.where(allowed, 0.0, -1e30).astype(jnp.float32)

    hf = gpt2_stack(h0, bias, params, num_heads=config["attention_heads"],
                    batch_shards=batch_shards)                   # (N, D) f32
    logits_p = lm_head(hf, params["head_w"])                     # (N, Vp)
    return logits_p[:, :V].reshape(B, L, V).transpose(1, 0, 2)   # (L, B, V)


# ----------------------- pure-JAX reference (f32) ---------------------------


def gpt2_reference(tokens, params, config, eps=1e-5):
    L, B = tokens.shape
    D = config["embedding_dim"]
    H = config["attention_heads"]
    V = config["vocab_size"]
    dh = D // H

    def ln(x, g, b):
        mu = x.mean(-1, keepdims=True)
        var = ((x - mu) ** 2).mean(-1, keepdims=True)
        return (x - mu) / jnp.sqrt(var + eps) * g + b

    tok = params["token_emb"][tokens]
    sos = jnp.ones((1, B, D), jnp.float32) * params["sos"]
    h = jnp.concatenate([sos, tok[:-1]], axis=0) + params["pos_emb"][:L][:, None, :]
    causal = jnp.tril(jnp.ones((L, L), bool))
    nl = params["wqkvT"].shape[0]
    for i in range(nl):
        wqkv = params["wqkvT"][i].astype(jnp.float32).T          # (D, 3D), scale folded
        bqkv = params["bqkvT"][i][:, 0]
        x = ln(h, params["ln1_g"][i, 0], params["ln1_b"][i, 0])
        qkv = x @ wqkv + bqkv
        q = qkv[..., :D].reshape(L, B, H, dh)
        k = qkv[..., D:2 * D].reshape(L, B, H, dh)
        v = qkv[..., 2 * D:].reshape(L, B, H, dh)
        s = jnp.einsum("qbhd,kbhd->bhqk", q, k)
        s = jnp.where(causal[None, None], s, -1e30)
        p = jax.nn.softmax(s, axis=-1)
        o = jnp.einsum("bhqk,kbhd->qbhd", p, v).reshape(L, B, D)
        a = o @ params["wo"][i].astype(jnp.float32) + params["bo"][i][0]
        x = x + a
        m = ln(x, params["ln2_g"][i, 0], params["ln2_b"][i, 0])
        m = m @ params["w1"][i].astype(jnp.float32) + params["b1"][i][0]
        m = 0.5 * m * (1.0 + jax.lax.erf(m * 0.7071067811865476))
        m = m @ params["w2"][i].astype(jnp.float32) + params["b2"][i][0]
        h = x + m
    h = ln(h, params["lnf_g"][0], params["lnf_b"][0])
    return h @ params["head_w"].astype(jnp.float32)[:, :V]


# ------------------------------ parameters ----------------------------------


def init_params(key, config):
    D = config["embedding_dim"]
    V = config["vocab_size"]
    S = config["sequence_size"]
    nl = config["transformer_layers"]
    H = config["attention_heads"]
    dh = D // H
    H4 = 4 * D
    Vp = ((V + 127) // 128) * 128          # lane-dense (>=128) LM-head output
    scale_q = 1.0 / float(dh) ** 0.5
    wdt = jnp.bfloat16                      # weights stored bf16 in HBM

    def normal(k, shape, scale=0.02):
        return (scale * jax.random.normal(k, shape)).astype(jnp.float32)

    keys = jax.random.split(key, 4 + nl)
    head_w = jnp.pad(normal(keys[3], (D, V)), ((0, 0), (0, Vp - V))).astype(wdt)

    wqkvT, bqkvT, wo, bo, w1, b1, w2, b2 = ([] for _ in range(8))
    for li in range(nl):
        ks = jax.random.split(keys[4 + li], 10)
        wq = normal(ks[0], (D, D)) * scale_q      # fold 1/sqrt(dh) into Q
        wk = normal(ks[1], (D, D))
        wv = normal(ks[2], (D, D))
        wqkvT.append(jnp.concatenate([wq, wk, wv], axis=1).T.astype(wdt))  # (3D, D)
        bq = normal(ks[3], (3 * D,)).at[:D].multiply(scale_q)
        bqkvT.append(bq.reshape(3 * D, 1))
        wo.append(normal(ks[4], (D, D)).astype(wdt))
        bo.append(normal(ks[5], (1, D)))
        w1.append(normal(ks[6], (D, H4)).astype(wdt))
        b1.append(normal(ks[7], (1, H4)))
        w2.append(normal(ks[8], (H4, D)).astype(wdt))
        b2.append(normal(ks[9], (1, D)))

    return {
        "token_emb": normal(keys[0], (V, D)),
        "pos_emb": normal(keys[1], (S, D)),
        "sos": jax.random.normal(keys[2], (D,)).astype(jnp.float32),
        "lnf_g": jnp.ones((1, D), jnp.float32),
        "lnf_b": jnp.zeros((1, D), jnp.float32),
        "head_w": head_w,
        "ln1_g": jnp.ones((nl, 1, D), jnp.float32),
        "ln1_b": jnp.zeros((nl, 1, D), jnp.float32),
        "ln2_g": jnp.ones((nl, 1, D), jnp.float32),
        "ln2_b": jnp.zeros((nl, 1, D), jnp.float32),
        "wqkvT": jnp.stack(wqkvT), "bqkvT": jnp.stack(bqkvT),
        "wo": jnp.stack(wo), "bo": jnp.stack(bo),
        "w1": jnp.stack(w1), "b1": jnp.stack(b1),
        "w2": jnp.stack(w2), "b2": jnp.stack(b2),
    }


if __name__ == "__main__":
    config = dict(
        vocab_size=16,
        embedding_dim=32,
        sequence_size=8,
        transformer_layers=2,
        attention_heads=4,
        dropout=0,
        feed_forward=128,
        padding_index=0,
    )
    L, B = 8, 2   # (length, batch) -- matches the PyTorch forward's x.shape

    key = jax.random.PRNGKey(0)
    k_tok, k_par = jax.random.split(key)
    tokens = jax.random.randint(k_tok, (L, B), 0, config["vocab_size"],
                                dtype=jnp.int32)
    params = init_params(k_par, config)

    shards = _default_batch_shards(B)
    fwd = jax.jit(functools.partial(gpt2_forward, config=config,
                                    batch_shards=shards))
    logits = jax.block_until_ready(fwd(tokens, params))
    assert logits.shape == (L, B, config["vocab_size"])
    assert bool(jnp.all(jnp.isfinite(logits)))

    # Numerics vs a pure-f32 JAX reference (tolerance covers bf16 matmuls and
    # the EUP approximate reciprocal in the softmax).
    ref = gpt2_reference(tokens, params, config)
    max_err = float(jnp.max(jnp.abs(logits - ref)))
    assert max_err < 5e-2, f"kernel vs reference max abs err {max_err}"

    # Also exercise the other batch-shard path (v7x dual-core uses 2 shards,
    # single-TensorCore chips use 1); results must match.
    other = 2 if shards == 1 else 1
    fwd2 = jax.jit(functools.partial(gpt2_forward, config=config,
                                     batch_shards=other))
    logits2 = jax.block_until_ready(fwd2(tokens, params))
    assert float(jnp.max(jnp.abs(logits - logits2))) < 1e-2

    print("KERNEL_OK")
</pallas_src>

<mosaic_0001>
module attributes {stable_mosaic.version = 11 : i64} {
  func.func @_lm_head_kernel(%arg0: i32, %arg1: i32, %arg2: memref<16x32xf32, #tpu.memory_space<vmem>>, %arg3: memref<32x128xbf16, #tpu.memory_space<vmem>>, %arg4: memref<16x128xf32, #tpu.memory_space<vmem>>) attributes {dimension_semantics = [#tpu.dimension_semantics<parallel>, #tpu.dimension_semantics<parallel>], iteration_bounds = array<i64: 1, 1>, scalar_prefetch = 0 : i64, scratch_operands = 0 : i64, tpu.core_type = #tpu.core_type<tc>, window_params = [{transform_indices = @transform_0, window_bounds = array<i64: 16, 32>}, {transform_indices = @transform_1, window_bounds = array<i64: 32, 128>}, {transform_indices = @transform_2, window_bounds = array<i64: 16, 128>}]} {
    %c0 = arith.constant 0 : index
    %c0_0 = arith.constant 0 : index
    %0 = vector.load %arg2[%c0, %c0_0] : memref<16x32xf32, #tpu.memory_space<vmem>>, vector<16x32xf32>
    %1 = arith.truncf %0 : vector<16x32xf32> to vector<16x32xbf16>
    %c0_1 = arith.constant 0 : index
    %c0_2 = arith.constant 0 : index
    %2 = vector.load %arg3[%c0_1, %c0_2] : memref<32x128xbf16, #tpu.memory_space<vmem>>, vector<32x128xbf16>
    %cst = arith.constant dense<0.000000e+00> : vector<16x128xf32>
    %3 = tpu.matmul %1, %2, %cst {dimension_numbers = #tpu.dot_dimension_numbers<[1], [0], [0], [1], [0, 0, 1, 1], [], []>} : vector<16x32xbf16>, vector<32x128xbf16>, vector<16x128xf32> -> vector<16x128xf32>
    %c0_3 = arith.constant 0 : index
    %c0_4 = arith.constant 0 : index
    %4 = vector.load %arg4[%c0_3, %c0_4] : memref<16x128xf32, #tpu.memory_space<vmem>>, vector<16x128xf32>
    tpu.vector_store %arg4[%c0_3, %c0_4], %3 {strides = array<i32>} : memref<16x128xf32, #tpu.memory_space<vmem>>, vector<16x128xf32>,
    return
  }
  func.func @transform_0(%arg0: i32, %arg1: i32) -> (i32, i32) {
    %c0_i32 = arith.constant 0 : i32
    %c0_i32_0 = arith.constant 0 : i32
    return %arg0, %c0_i32 : i32, i32
  }
  func.func @transform_1(%arg0: i32, %arg1: i32) -> (i32, i32) {
    %c0_i32 = arith.constant 0 : i32
    %c0_i32_0 = arith.constant 0 : i32
    return %c0_i32, %arg1 : i32, i32
  }
  func.func @transform_2(%arg0: i32, %arg1: i32) -> (i32, i32) {
    %c0_i32 = arith.constant 0 : i32
    return %arg0, %arg1 : i32, i32
  }
}

module attributes {stable_mosaic.version = 11 : i64} {
  func.func @_gpt2_stack_kernel(%arg0: i32, %arg1: i32, %arg2: memref<16x32xf32, #tpu.memory_space<vmem>>, %arg3: memref<16x16xf32, #tpu.memory_space<vmem>>, %arg4: memref<1x1x32xf32, #tpu.memory_space<vmem>>, %arg5: memref<1x1x32xf32, #tpu.memory_space<vmem>>, %arg6: memref<1x96x32xbf16, #tpu.memory_space<vmem>>, %arg7: memref<1x96x1xf32, #tpu.memory_space<vmem>>, %arg8: memref<1x32x32xbf16, #tpu.memory_space<vmem>>, %arg9: memref<1x1x32xf32, #tpu.memory_space<vmem>>, %arg10: memref<1x1x32xf32, #tpu.memory_space<vmem>>, %arg11: memref<1x1x32xf32, #tpu.memory_space<vmem>>, %arg12: memref<1x32x128xbf16, #tpu.memory_space<vmem>>, %arg13: memref<1x1x128xf32, #tpu.memory_space<vmem>>, %arg14: memref<1x128x32xbf16, #tpu.memory_space<vmem>>, %arg15: memref<1x1x32xf32, #tpu.memory_space<vmem>>, %arg16: memref<1x32xf32, #tpu.memory_space<vmem>>, %arg17: memref<1x32xf32, #tpu.memory_space<vmem>>, %arg18: memref<16x32xf32, #tpu.memory_space<vmem>>, %arg19: memref<16x32xf32, #tpu.memory_space<vmem>>, %arg20: memref<96x16xf32, #tpu.memory_space<vmem>>, %arg21: memref<32x16xf32, #tpu.memory_space<vmem>>) attributes {dimension_semantics = [#tpu.dimension_semantics<parallel>, #tpu.dimension_semantics<arbitrary>], iteration_bounds = array<i64: 1, 2>, scalar_prefetch = 0 : i64, scratch_operands = 3 : i64, tpu.core_type = #tpu.core_type<tc>, window_params = [{transform_indices = @transform_0, window_bounds = array<i64: 16, 32>}, {pipeline_mode = #tpu.pipeline_mode<synchronous>, transform_indices = @transform_1, window_bounds = array<i64: 16, 16>}, {transform_indices = @transform_2, window_bounds = array<i64: 1, 1, 32>}, {transform_indices = @transform_3, window_bounds = array<i64: 1, 1, 32>}, {transform_indices = @transform_4, window_bounds = array<i64: 1, 96, 32>}, {transform_indices = @transform_5, window_bounds = array<i64: 1, 96, 1>}, {transform_indices = @transform_6, window_bounds = array<i64: 1, 32, 32>}, {transform_indices = @transform_7, window_bounds = array<i64: 1, 1, 32>}, {transform_indices = @transform_8, window_bounds = array<i64: 1, 1, 32>}, {transform_indices = @transform_9, window_bounds = array<i64: 1, 1, 32>}, {transform_indices = @transform_10, window_bounds = array<i64: 1, 32, 128>}, {transform_indices = @transform_11, window_bounds = array<i64: 1, 1, 128>}, {transform_indices = @transform_12, window_bounds = array<i64: 1, 128, 32>}, {transform_indices = @transform_13, window_bounds = array<i64: 1, 1, 32>}, {pipeline_mode = #tpu.pipeline_mode<synchronous>, transform_indices = @transform_14, window_bounds = array<i64: 1, 32>}, {pipeline_mode = #tpu.pipeline_mode<synchronous>, transform_indices = @transform_15, window_bounds = array<i64: 1, 32>}, {transform_indices = @transform_16, window_bounds = array<i64: 16, 32>}]} {
    %c0_i32 = arith.constant 0 : i32
    %0 = arith.cmpi eq, %arg1, %c0_i32 : i32
    %1 = arith.extui %0 : i1 to i32
    %c0_i32_0 = arith.constant 0 : i32
    %2 = arith.cmpi ne, %1, %c0_i32_0 : i32
    scf.if %2 {
      %c0_66 = arith.constant 0 : index
      %c0_67 = arith.constant 0 : index
      %106 = vector.load %arg2[%c0_66, %c0_67] : memref<16x32xf32, #tpu.memory_space<vmem>>, vector<16x32xf32>
      %c0_68 = arith.constant 0 : index
      %c0_69 = arith.constant 0 : index
      %107 = vector.load %arg19[%c0_68, %c0_69] : memref<16x32xf32, #tpu.memory_space<vmem>>, vector<16x32xf32>
      tpu.vector_store %arg19[%c0_68, %c0_69], %106 {strides = array<i32>} : memref<16x32xf32, #tpu.memory_space<vmem>>, vector<16x32xf32>,
    } else {
    }
    %c0 = arith.constant 0 : index
    %c0_1 = arith.constant 0 : index
    %3 = vector.load %arg19[%c0, %c0_1] : memref<16x32xf32, #tpu.memory_space<vmem>>, vector<16x32xf32>
    %c0_2 = arith.constant 0 : index
    %c0_3 = arith.constant 0 : index
    %c0_4 = arith.constant 0 : index
    %4 = vector.load %arg4[%c0_2, %c0_3, %c0_4] : memref<1x1x32xf32, #tpu.memory_space<vmem>>, vector<1x1x32xf32>
    %5 = vector.shape_cast %4 : vector<1x1x32xf32> to vector<1x32xf32>
    %c0_5 = arith.constant 0 : index
    %c0_6 = arith.constant 0 : index
    %c0_7 = arith.constant 0 : index
    %6 = vector.load %arg5[%c0_5, %c0_6, %c0_7] : memref<1x1x32xf32, #tpu.memory_space<vmem>>, vector<1x1x32xf32>
    %7 = vector.shape_cast %6 : vector<1x1x32xf32> to vector<1x32xf32>
    %cst = arith.constant dense<0.000000e+00> : vector<16xf32>
    %8 = vector.multi_reduction <add>, %3, %cst [1] : vector<16x32xf32> to vector<16xf32>
    %9 = vector.shape_cast %8 : vector<16xf32> to vector<16x1xf32>
    %cst_8 = arith.constant 3.200000e+01 : f32
    %10 = vector.broadcast %cst_8 : f32 to vector<16x1xf32>
    %11 = arith.divf %9, %10 : vector<16x1xf32>
    %12 = vector.broadcast %11 : vector<16x1xf32> to vector<16x32xf32>
    %13 = arith.subf %3, %12 : vector<16x32xf32>
    %14 = arith.mulf %13, %13 : vector<16x32xf32>
    %cst_9 = arith.constant dense<0.000000e+00> : vector<16xf32>
    %15 = vector.multi_reduction <add>, %14, %cst_9 [1] : vector<16x32xf32> to vector<16xf32>
    %16 = vector.shape_cast %15 : vector<16xf32> to vector<16x1xf32>
    %cst_10 = arith.constant 3.200000e+01 : f32
    %17 = vector.broadcast %cst_10 : f32 to vector<16x1xf32>
    %18 = arith.divf %16, %17 : vector<16x1xf32>
    %19 = vector.broadcast %11 : vector<16x1xf32> to vector<16x32xf32>
    %20 = arith.subf %3, %19 : vector<16x32xf32>
    %cst_11 = arith.constant 9.99999974E-6 : f32
    %21 = vector.broadcast %cst_11 : f32 to vector<16x1xf32>
    %22 = arith.addf %18, %21 : vector<16x1xf32>
    %23 = math.rsqrt %22 : vector<16x1xf32>
    %24 = vector.broadcast %23 : vector<16x1xf32> to vector<16x32xf32>
    %25 = arith.mulf %20, %24 : vector<16x32xf32>
    %26 = vector.broadcast %5 : vector<1x32xf32> to vector<16x32xf32>
    %27 = arith.mulf %25, %26 : vector<16x32xf32>
    %28 = vector.broadcast %7 : vector<1x32xf32> to vector<16x32xf32>
    %29 = arith.addf %27, %28 : vector<16x32xf32>
    %30 = arith.truncf %29 : vector<16x32xf32> to vector<16x32xbf16>
    %c0_12 = arith.constant 0 : index
    %c0_13 = arith.constant 0 : index
    %c0_14 = arith.constant 0 : index
    %31 = vector.load %arg6[%c0_12, %c0_13, %c0_14] : memref<1x96x32xbf16, #tpu.memory_space<vmem>>, vector<1x96x32xbf16>
    %32 = vector.shape_cast %31 : vector<1x96x32xbf16> to vector<96x32xbf16>
    %cst_15 = arith.constant dense<0.000000e+00> : vector<96x16xf32>
    %33 = tpu.matmul %32, %30, %cst_15 {dimension_numbers = #tpu.dot_dimension_numbers<[1], [1], [0], [0], [0, 0, 1, 0], [], []>} : vector<96x32xbf16>, vector<16x32xbf16>, vector<96x16xf32> -> vector<96x16xf32>
    %c0_16 = arith.constant 0 : index
    %c0_17 = arith.constant 0 : index
    %c0_18 = arith.constant 0 : index
    %34 = vector.load %arg7[%c0_16, %c0_17, %c0_18] : memref<1x96x1xf32, #tpu.memory_space<vmem>>, vector<1x96x1xf32>
    %35 = vector.shape_cast %34 : vector<1x96x1xf32> to vector<96x1xf32>
    %36 = vector.broadcast %35 : vector<96x1xf32> to vector<96x16xf32>
    %37 = arith.addf %33, %36 : vector<96x16xf32>
    %c0_19 = arith.constant 0 : index
    %c0_20 = arith.constant 0 : index
    %38 = vector.load %arg20[%c0_19, %c0_20] : memref<96x16xf32, #tpu.memory_space<vmem>>, vector<96x16xf32>
    tpu.vector_store %arg20[%c0_19, %c0_20], %37 {strides = array<i32>} : memref<96x16xf32, #tpu.memory_space<vmem>>, vector<96x16xf32>,
    %c0_21 = arith.constant 0 : index
    %c0_22 = arith.constant 0 : index
    %39 = vector.load %arg3[%c0_21, %c0_22] : memref<16x16xf32, #tpu.memory_space<vmem>>, vector<16x16xf32>
    %c0_i32_23 = arith.constant 0 : i32
    %c4_i32 = arith.constant 4 : i32
    %40 = arith.addi %c0_i32_23, %c4_i32 : i32
    %c1_i32 = arith.constant 1 : i32
    scf.for %arg22 = %c0_i32_23 to %40 step %c1_i32  : i32 {
      %c1_i32_66 = arith.constant 1 : i32
      %106 = arith.muli %arg22, %c1_i32_66 : i32
      %c0_i32_67 = arith.constant 0 : i32
      %107 = arith.addi %c0_i32_67, %106 : i32
      %c8_i32 = arith.constant 8 : i32
      %108 = arith.muli %107, %c8_i32 : i32
      %109 = tpu.assume_multiple %108, 8 : i32
      %110 = arith.index_cast %109 : i32 to index
      %c0_68 = arith.constant 0 : index
      %111 = vector.load %arg20[%110, %c0_68] : memref<96x16xf32, #tpu.memory_space<vmem>>, vector<8x16xf32>
      %112 = arith.truncf %111 : vector<8x16xf32> to vector<8x16xbf16>
      %c32_i32 = arith.constant 32 : i32
      %113 = arith.addi %c32_i32, %109 : i32
      %114 = arith.index_cast %113 : i32 to index
      %c0_69 = arith.constant 0 : index
      %115 = vector.load %arg20[%114, %c0_69] : memref<96x16xf32, #tpu.memory_space<vmem>>, vector<8x16xf32>
      %116 = arith.truncf %115 : vector<8x16xf32> to vector<8x16xbf16>
      %c64_i32 = arith.constant 64 : i32
      %117 = arith.addi %c64_i32, %109 : i32
      %118 = arith.index_cast %117 : i32 to index
      %c0_70 = arith.constant 0 : index
      %119 = vector.load %arg20[%118, %c0_70] : memref<96x16xf32, #tpu.memory_space<vmem>>, vector<8x16xf32>
      %120 = arith.truncf %119 : vector<8x16xf32> to vector<8x16xbf16>
      %cst_71 = arith.constant dense<0.000000e+00> : vector<16x16xf32>
      %121 = tpu.matmul %112, %116, %cst_71 {dimension_numbers = #tpu.dot_dimension_numbers<[0], [0], [1], [1], [0, 1, 1, 1], [], []>} : vector<8x16xbf16>, vector<8x16xbf16>, vector<16x16xf32> -> vector<16x16xf32>
      %122 = arith.addf %121, %39 : vector<16x16xf32>
      %cst_72 = arith.constant dense<0xFF800000> : vector<16xf32>
      %123 = vector.multi_reduction <maximumf>, %122, %cst_72 [1] : vector<16x16xf32> to vector<16xf32>
      %124 = vector.shape_cast %123 : vector<16xf32> to vector<16x1xf32>
      %125 = vector.broadcast %124 : vector<16x1xf32> to vector<16x16xf32>
      %126 = arith.subf %122, %125 : vector<16x16xf32>
      %127 = math.exp %126 : vector<16x16xf32>
      %cst_73 = arith.constant dense<0.000000e+00> : vector<16xf32>
      %128 = vector.multi_reduction <add>, %127, %cst_73 [1] : vector<16x16xf32> to vector<16xf32>
      %129 = vector.shape_cast %128 : vector<16xf32> to vector<16x1xf32>
      %130 = tpu.reciprocal %129 {approx = true} : vector<16x1xf32> -> vector<16x1xf32>
      %131 = vector.broadcast %130 : vector<16x1xf32> to vector<16x16xf32>
      %132 = arith.mulf %127, %131 : vector<16x16xf32>
      %133 = arith.truncf %132 : vector<16x16xf32> to vector<16x16xbf16>
      %cst_74 = arith.constant dense<0.000000e+00> : vector<8x16xf32>
      %134 = tpu.matmul %120, %133, %cst_74 {dimension_numbers = #tpu.dot_dimension_numbers<[1], [1], [0], [0], [0, 0, 1, 0], [], []>} : vector<8x16xbf16>, vector<16x16xbf16>, vector<8x16xf32> -> vector<8x16xf32>
      %135 = arith.index_cast %109 : i32 to index
      %c0_75 = arith.constant 0 : index
      %136 = vector.load %arg21[%135, %c0_75] : memref<32x16xf32, #tpu.memory_space<vmem>>, vector<8x16xf32>
      tpu.vector_store %arg21[%135, %c0_75], %134 {strides = array<i32>} : memref<32x16xf32, #tpu.memory_space<vmem>>, vector<8x16xf32>,
    }
    %c4_i32_24 = arith.constant 4 : i32
    %c0_25 = arith.constant 0 : index
    %c0_26 = arith.constant 0 : index
    %41 = vector.load %arg21[%c0_25, %c0_26] : memref<32x16xf32, #tpu.memory_space<vmem>>, vector<32x16xf32>
    %42 = arith.truncf %41 : vector<32x16xf32> to vector<32x16xbf16>
    %c0_27 = arith.constant 0 : index
    %c0_28 = arith.constant 0 : index
    %c0_29 = arith.constant 0 : index
    %43 = vector.load %arg8[%c0_27, %c0_28, %c0_29] : memref<1x32x32xbf16, #tpu.memory_space<vmem>>, vector<1x32x32xbf16>
    %44 = vector.shape_cast %43 : vector<1x32x32xbf16> to vector<32x32xbf16>
    %cst_30 = arith.constant dense<0.000000e+00> : vector<16x32xf32>
    %45 = tpu.matmul %42, %44, %cst_30 {dimension_numbers = #tpu.dot_dimension_numbers<[0], [0], [1], [1], [0, 1, 1, 1], [], []>} : vector<32x16xbf16>, vector<32x32xbf16>, vector<16x32xf32> -> vector<16x32xf32>
    %c0_31 = arith.constant 0 : index
    %c0_32 = arith.constant 0 : index
    %c0_33 = arith.constant 0 : index
    %46 = vector.load %arg9[%c0_31, %c0_32, %c0_33] : memref<1x1x32xf32, #tpu.memory_space<vmem>>, vector<1x1x32xf32>
    %47 = vector.shape_cast %46 : vector<1x1x32xf32> to vector<1x32xf32>
    %48 = vector.broadcast %47 : vector<1x32xf32> to vector<16x32xf32>
    %49 = arith.addf %45, %48 : vector<16x32xf32>
    %50 = arith.addf %29, %49 : vector<16x32xf32>
    %c0_34 = arith.constant 0 : index
    %c0_35 = arith.constant 0 : index
    %c0_36 = arith.constant 0 : index
    %51 = vector.load %arg10[%c0_34, %c0_35, %c0_36] : memref<1x1x32xf32, #tpu.memory_space<vmem>>, vector<1x1x32xf32>
    %52 = vector.shape_cast %51 : vector<1x1x32xf32> to vector<1x32xf32>
    %c0_37 = arith.constant 0 : index
    %c0_38 = arith.constant 0 : index
    %c0_39 = arith.constant 0 : index
    %53 = vector.load %arg11[%c0_37, %c0_38, %c0_39] : memref<1x1x32xf32, #tpu.memory_space<vmem>>, vector<1x1x32xf32>
    %54 = vector.shape_cast %53 : vector<1x1x32xf32> to vector<1x32xf32>
    %cst_40 = arith.constant dense<0.000000e+00> : vector<16xf32>
    %55 = vector.multi_reduction <add>, %50, %cst_40 [1] : vector<16x32xf32> to vector<16xf32>
    %56 = vector.shape_cast %55 : vector<16xf32> to vector<16x1xf32>
    %cst_41 = arith.constant 3.200000e+01 : f32
    %57 = vector.broadcast %cst_41 : f32 to vector<16x1xf32>
    %58 = arith.divf %56, %57 : vector<16x1xf32>
    %59 = vector.broadcast %58 : vector<16x1xf32> to vector<16x32xf32>
    %60 = arith.subf %50, %59 : vector<16x32xf32>
    %61 = arith.mulf %60, %60 : vector<16x32xf32>
    %cst_42 = arith.constant dense<0.000000e+00> : vector<16xf32>
    %62 = vector.multi_reduction <add>, %61, %cst_42 [1] : vector<16x32xf32> to vector<16xf32>
    %63 = vector.shape_cast %62 : vector<16xf32> to vector<16x1xf32>
    %cst_43 = arith.constant 3.200000e+01 : f32
    %64 = vector.broadcast %cst_43 : f32 to vector<16x1xf32>
    %65 = arith.divf %63, %64 : vector<16x1xf32>
    %66 = vector.broadcast %58 : vector<16x1xf32> to vector<16x32xf32>
    %67 = arith.subf %50, %66 : vector<16x32xf32>
    %cst_44 = arith.constant 9.99999974E-6 : f32
    %68 = vector.broadcast %cst_44 : f32 to vector<16x1xf32>
    %69 = arith.addf %65, %68 : vector<16x1xf32>
    %70 = math.rsqrt %69 : vector<16x1xf32>
    %71 = vector.broadcast %70 : vector<16x1xf32> to vector<16x32xf32>
    %72 = arith.mulf %67, %71 : vector<16x32xf32>
    %73 = vector.broadcast %52 : vector<1x32xf32> to vector<16x32xf32>
    %74 = arith.mulf %72, %73 : vector<16x32xf32>
    %75 = vector.broadcast %54 : vector<1x32xf32> to vector<16x32xf32>
    %76 = arith.addf %74, %75 : vector<16x32xf32>
    %c0_45 = arith.constant 0 : index
    %c0_46 = arith.constant 0 : index
    %c0_47 = arith.constant 0 : index
    %77 = vector.load %arg12[%c0_45, %c0_46, %c0_47] : memref<1x32x128xbf16, #tpu.memory_space<vmem>>, vector<1x32x128xbf16>
    %78 = vector.shape_cast %77 : vector<1x32x128xbf16> to vector<32x128xbf16>
    %79 = arith.truncf %76 : vector<16x32xf32> to vector<16x32xbf16>
    %cst_48 = arith.constant dense<0.000000e+00> : vector<16x128xf32>
    %80 = tpu.matmul %79, %78, %cst_48 {dimension_numbers = #tpu.dot_dimension_numbers<[1], [0], [0], [1], [0, 0, 1, 1], [], []>} : vector<16x32xbf16>, vector<32x128xbf16>, vector<16x128xf32> -> vector<16x128xf32>
    %c0_49 = arith.constant 0 : index
    %c0_50 = arith.constant 0 : index
    %c0_51 = arith.constant 0 : index
    %81 = vector.load %arg13[%c0_49, %c0_50, %c0_51] : memref<1x1x128xf32, #tpu.memory_space<vmem>>, vector<1x1x128xf32>
    %82 = vector.shape_cast %81 : vector<1x1x128xf32> to vector<1x128xf32>
    %83 = vector.broadcast %82 : vector<1x128xf32> to vector<16x128xf32>
    %84 = arith.addf %80, %83 : vector<16x128xf32>
    %cst_52 = arith.constant 5.000000e-01 : f32
    %85 = vector.broadcast %cst_52 : f32 to vector<16x128xf32>
    %86 = arith.mulf %85, %84 : vector<16x128xf32>
    %cst_53 = arith.constant 0.707106769 : f32
    %87 = vector.broadcast %cst_53 : f32 to vector<16x128xf32>
    %88 = arith.mulf %84, %87 : vector<16x128xf32>
    %89 = math.erf %88 : vector<16x128xf32>
    %cst_54 = arith.constant 1.000000e+00 : f32
    %90 = vector.broadcast %cst_54 : f32 to vector<16x128xf32>
    %91 = arith.addf %90, %89 : vector<16x128xf32>
    %92 = arith.mulf %86, %91 : vector<16x128xf32>
    %c0_55 = arith.constant 0 : index
    %c0_56 = arith.constant 0 : index
    %c0_57 = arith.constant 0 : index
    %93 = vector.load %arg14[%c0_55, %c0_56, %c0_57] : memref<1x128x32xbf16, #tpu.memory_space<vmem>>, vector<1x128x32xbf16>
    %94 = vector.shape_cast %93 : vector<1x128x32xbf16> to vector<128x32xbf16>
    %95 = arith.truncf %92 : vector<16x128xf32> to vector<16x128xbf16>
    %cst_58 = arith.constant dense<0.000000e+00> : vector<16x32xf32>
    %96 = tpu.matmul %95, %94, %cst_58 {dimension_numbers = #tpu.dot_dimension_numbers<[1], [0], [0], [1], [0, 0, 1, 1], [], []>} : vector<16x128xbf16>, vector<128x32xbf16>, vector<16x32xf32> -> vector<16x32xf32>
    %c0_59 = arith.constant 0 : index
    %c0_60 = arith.constant 0 : index
    %c0_61 = arith.constant 0 : index
    %97 = vector.load %arg15[%c0_59, %c0_60, %c0_61] : memref<1x1x32xf32, #tpu.memory_space<vmem>>, vector<1x1x32xf32>
    %98 = vector.shape_cast %97 : vector<1x1x32xf32> to vector<1x32xf32>
    %99 = vector.broadcast %98 : vector<1x32xf32> to vector<16x32xf32>
    %100 = arith.addf %96, %99 : vector<16x32xf32>
    %101 = arith.addf %50, %100 : vector<16x32xf32>
    %c0_62 = arith.constant 0 : index
    %c0_63 = arith.constant 0 : index
    %102 = vector.load %arg19[%c0_62, %c0_63] : memref<16x32xf32, #tpu.memory_space<vmem>>, vector<16x32xf32>
    tpu.vector_store %arg19[%c0_62, %c0_63], %101 {strides = array<i32>} : memref<16x32xf32, #tpu.memory_space<vmem>>, vector<16x32xf32>,
    %c1_i32_64 = arith.constant 1 : i32
    %103 = arith.cmpi eq, %arg1, %c1_i32_64 : i32
    %104 = arith.extui %103 : i1 to i32
    %c0_i32_65 = arith.constant 0 : i32
    %105 = arith.cmpi ne, %104, %c0_i32_65 : i32
    scf.if %105 {
      %c0_66 = arith.constant 0 : index
      %c0_67 = arith.constant 0 : index
      %106 = vector.load %arg16[%c0_66, %c0_67] : memref<1x32xf32, #tpu.memory_space<vmem>>, vector<1x32xf32>
      %c0_68 = arith.constant 0 : index
      %c0_69 = arith.constant 0 : index
      %107 = vector.load %arg17[%c0_68, %c0_69] : memref<1x32xf32, #tpu.memory_space<vmem>>, vector<1x32xf32>
      %cst_70 = arith.constant dense<0.000000e+00> : vector<16xf32>
      %108 = vector.multi_reduction <add>, %101, %cst_70 [1] : vector<16x32xf32> to vector<16xf32>
      %109 = vector.shape_cast %108 : vector<16xf32> to vector<16x1xf32>
      %cst_71 = arith.constant 3.200000e+01 : f32
      %110 = vector.broadcast %cst_71 : f32 to vector<16x1xf32>
      %111 = arith.divf %109, %110 : vector<16x1xf32>
      %112 = vector.broadcast %111 : vector<16x1xf32> to vector<16x32xf32>
      %113 = arith.subf %101, %112 : vector<16x32xf32>
      %114 = arith.mulf %113, %113 : vector<16x32xf32>
      %cst_72 = arith.constant dense<0.000000e+00> : vector<16xf32>
      %115 = vector.multi_reduction <add>, %114, %cst_72 [1] : vector<16x32xf32> to vector<16xf32>
      %116 = vector.shape_cast %115 : vector<16xf32> to vector<16x1xf32>
      %cst_73 = arith.constant 3.200000e+01 : f32
      %117 = vector.broadcast %cst_73 : f32 to vector<16x1xf32>
      %118 = arith.divf %116, %117 : vector<16x1xf32>
      %119 = vector.broadcast %111 : vector<16x1xf32> to vector<16x32xf32>
      %120 = arith.subf %101, %119 : vector<16x32xf32>
      %cst_74 = arith.constant 9.99999974E-6 : f32
      %121 = vector.broadcast %cst_74 : f32 to vector<16x1xf32>
      %122 = arith.addf %118, %121 : vector<16x1xf32>
      %123 = math.rsqrt %122 : vector<16x1xf32>
      %124 = vector.broadcast %123 : vector<16x1xf32> to vector<16x32xf32>
      %125 = arith.mulf %120, %124 : vector<16x32xf32>
      %126 = vector.broadcast %106 : vector<1x32xf32> to vector<16x32xf32>
      %127 = arith.mulf %125, %126 : vector<16x32xf32>
      %128 = vector.broadcast %107 : vector<1x32xf32> to vector<16x32xf32>
      %129 = arith.addf %127, %128 : vector<16x32xf32>
      %c0_75 = arith.constant 0 : index
      %c0_76 = arith.constant 0 : index
      %130 = vector.load %arg18[%c0_75, %c0_76] : memref<16x32xf32, #tpu.memory_space<vmem>>, vector<16x32xf32>
      tpu.vector_store %arg18[%c0_75, %c0_76], %129 {strides = array<i32>} : memref<16x32xf32, #tpu.memory_space<vmem>>, vector<16x32xf32>,
    } else {
    }
    return
  }
  func.func @transform_0(%arg0: i32, %arg1: i32) -> (i32, i32) {
    %c0_i32 = arith.constant 0 : i32
    %c0_i32_0 = arith.constant 0 : i32
    return %arg0, %c0_i32 : i32, i32
  }
  func.func @transform_1(%arg0: i32, %arg1: i32) -> (i32, i32) {
    %c0_i32 = arith.constant 0 : i32
    %c0_i32_0 = arith.constant 0 : i32
    %c0_i32_1 = arith.constant 0 : i32
    return %c0_i32, %c0_i32_0 : i32, i32
  }
  func.func @transform_2(%arg0: i32, %arg1: i32) -> (i32, i32, i32) {
    %c0_i32 = arith.constant 0 : i32
    %c0_i32_0 = arith.constant 0 : i32
    %c0_i32_1 = arith.constant 0 : i32
    return %arg1, %c0_i32, %c0_i32_0 : i32, i32, i32
  }
  func.func @transform_3(%arg0: i32, %arg1: i32) -> (i32, i32, i32) {
    %c0_i32 = arith.constant 0 : i32
    %c0_i32_0 = arith.constant 0 : i32
    %c0_i32_1 = arith.constant 0 : i32
    return %arg1, %c0_i32, %c0_i32_0 : i32, i32, i32
  }
  func.func @transform_4(%arg0: i32, %arg1: i32) -> (i32, i32, i32) {
    %c0_i32 = arith.constant 0 : i32
    %c0_i32_0 = arith.constant 0 : i32
    %c0_i32_1 = arith.constant 0 : i32
    return %arg1, %c0_i32, %c0_i32_0 : i32, i32, i32
  }
  func.func @transform_5(%arg0: i32, %arg1: i32) -> (i32, i32, i32) {
    %c0_i32 = arith.constant 0 : i32
    %c0_i32_0 = arith.constant 0 : i32
    %c0_i32_1 = arith.constant 0 : i32
    return %arg1, %c0_i32, %c0_i32_0 : i32, i32, i32
  }
  func.func @transform_6(%arg0: i32, %arg1: i32) -> (i32, i32, i32) {
    %c0_i32 = arith.constant 0 : i32
    %c0_i32_0 = arith.constant 0 : i32
    %c0_i32_1 = arith.constant 0 : i32
    return %arg1, %c0_i32, %c0_i32_0 : i32, i32, i32
  }
  func.func @transform_7(%arg0: i32, %arg1: i32) -> (i32, i32, i32) {
    %c0_i32 = arith.constant 0 : i32
    %c0_i32_0 = arith.constant 0 : i32
    %c0_i32_1 = arith.constant 0 : i32
    return %arg1, %c0_i32, %c0_i32_0 : i32, i32, i32
  }
  func.func @transform_8(%arg0: i32, %arg1: i32) -> (i32, i32, i32) {
    %c0_i32 = arith.constant 0 : i32
    %c0_i32_0 = arith.constant 0 : i32
    %c0_i32_1 = arith.constant 0 : i32
    return %arg1, %c0_i32, %c0_i32_0 : i32, i32, i32
  }
  func.func @transform_9(%arg0: i32, %arg1: i32) -> (i32, i32, i32) {
    %c0_i32 = arith.constant 0 : i32
    %c0_i32_0 = arith.constant 0 : i32
    %c0_i32_1 = arith.constant 0 : i32
    return %arg1, %c0_i32, %c0_i32_0 : i32, i32, i32
  }
  func.func @transform_10(%arg0: i32, %arg1: i32) -> (i32, i32, i32) {
    %c0_i32 = arith.constant 0 : i32
    %c0_i32_0 = arith.constant 0 : i32
    %c0_i32_1 = arith.constant 0 : i32
    return %arg1, %c0_i32, %c0_i32_0 : i32, i32, i32
  }
  func.func @transform_11(%arg0: i32, %arg1: i32) -> (i32, i32, i32) {
    %c0_i32 = arith.constant 0 : i32
    %c0_i32_0 = arith.constant 0 : i32
    %c0_i32_1 = arith.constant 0 : i32
    return %arg1, %c0_i32, %c0_i32_0 : i32, i32, i32
  }
  func.func @transform_12(%arg0: i32, %arg1: i32) -> (i32, i32, i32) {
    %c0_i32 = arith.constant 0 : i32
    %c0_i32_0 = arith.constant 0 : i32
    %c0_i32_1 = arith.constant 0 : i32
    return %arg1, %c0_i32, %c0_i32_0 : i32, i32, i32
  }
  func.func @transform_13(%arg0: i32, %arg1: i32) -> (i32, i32, i32) {
    %c0_i32 = arith.constant 0 : i32
    %c0_i32_0 = arith.constant 0 : i32
    %c0_i32_1 = arith.constant 0 : i32
    return %arg1, %c0_i32, %c0_i32_0 : i32, i32, i32
  }
  func.func @transform_14(%arg0: i32, %arg1: i32) -> (i32, i32) {
    %c0_i32 = arith.constant 0 : i32
    %c0_i32_0 = arith.constant 0 : i32
    %c0_i32_1 = arith.constant 0 : i32
    return %c0_i32, %c0_i32_0 : i32, i32
  }
  func.func @transform_15(%arg0: i32, %arg1: i32) -> (i32, i32) {
    %c0_i32 = arith.constant 0 : i32
    %c0_i32_0 = arith.constant 0 : i32
    %c0_i32_1 = arith.constant 0 : i32
    return %c0_i32, %c0_i32_0 : i32, i32
  }
  func.func @transform_16(%arg0: i32, %arg1: i32) -> (i32, i32) {
    %c0_i32 = arith.constant 0 : i32
    %c0_i32_0 = arith.constant 0 : i32
    return %arg0, %c0_i32 : i32, i32
  }
}

</mosaic_0001>

<bundles_post_ra>
// kernel: mul.5
= control target key start
LH: loop header
LB: loop body
LE: loop exit
PB: predicated region body
PF: predicated region fallthrough
CT: control target
= control target key end

     0   :  { %s28_s0 = inlined_call_operand.vmem [shape: f32[32], index: 0, kind: input, shape index: {}]   ;;  %s29_s1 = inlined_call_operand.vmem [shape: f32[1,2,32], index: 1, kind: output, shape index: {}]  }
   0x1   :  { %v4_v0 = vld [vmem:[%s28_s0] ss:$0 sm:$0xff] }
   0x2   :  { %5 = vst [vmem:[%s29_s1] sm:$0x1] %v4_v0  ;;  %8 = vst [vmem:[%s29_s1 + $0x1] sm:$0x1] %v4_v0 }

// kernel: gpt2_forward.3
= control target key start
LH: loop header
LB: loop body
LE: loop exit
PB: predicated region body
PF: predicated region fallthrough
CT: control target
= control target key end

     0   :  { %v100_v0 = vmov 0.0   ;;  %vm101_vm0 = vmmov 0   ;;  %vm31_vm1 = vcmask 261120   ;;  %s135_s1 = inlined_call_operand.vmem [shape: bf16[32,128], index: 1, kind: input, shape index: {}]   ;;  %s136_s0 = inlined_call_operand.vmem [shape: f32[16,32], index: 0, kind: input, shape index: {}]   ;;  %s137_s2 = inlined_call_operand.vmem [shape: f32[16,128], index: 2, kind: output, shape index: {}]  }
   0x1   :  { %88 = vmatprep.subr.bf16.mxu0 %v100_v0  ;;  %v98_v1 = vld [vmem:[%s135_s1] sm:$0xff]   ;;  %92 = vmatprep.mubr.msk.bf16.mxu0 %vm101_vm0, %v100_v0  ;;  %v99_v2 = vld [vmem:[%s135_s1 + $0x8] sm:$0xff]  }
   0x2   :  { %89 = vmatpush3.bf16.msra.mxu0 %v98_v1  ;;  %v12_v3 = vld [vmem:[%s136_s0] sm:$0xff]  ;;  %v13_v4 = vld [vmem:[%s136_s0 + $0x8] sm:$0xff] }
   0x3   :  { %90 = vmatprep.subr.bf16.mxu0 %v100_v0  ;;  %v14_v5 = vpack.c.bf16 %v13_v4, %v12_v3 }
   0x6   :  { %91 = vmatpush3.bf16.msra.mxu0 %v99_v2 }
   0x9   :  { %93 = vmatmul.mubr.msk.bf16.vlgmr.msra.gmra.mrb[0].mxu0 %vm31_vm1, %v14_v5 }
  0xdc   :  { %v69_v6 = vpop.f32.mrb[0].mxu0 }
  0xdd   :  { %76 = vst [vmem:[%s137_s2] sm:$0xff] %v69_v6  ;;  %v94_v7 = vpop.f32.mrb[1].mxu0 }
  0xde   :  { %v72_v8 = vpop.f32.mrb[2].mxu0 }
  0xdf   :  { %77 = vst [vmem:[%s137_s2 + $0x8] sm:$0xff] %v72_v8  ;;  %v95_v9 = vpop.f32.mrb[3].mxu0 }

// kernel: gpt2_forward.2
= control target key start
LH: loop header
LB: loop body
LE: loop exit
PB: predicated region body
PF: predicated region fallthrough
CT: control target
= control target key end

     0   :  { %s2124_s21 = smov 0   ;;  %s2126_s22 = smov 0   ;;  %s2408_s0 = inlined_call_operand.vmem [shape: f32[16,32], index: 0, kind: input, shape index: {}]   ;;  %s2409_s1 = inlined_call_operand.vmem [shape: f32[16,16], index: 1, kind: input, shape index: {}]   ;;  %s2410_s2 = inlined_call_operand.vmem [shape: f32[2,1,32], index: 2, kind: input, shape index: {}]   ;;  %s2411_s3 = inlined_call_operand.vmem [shape: f32[2,1,32], index: 3, kind: input, shape index: {}]   ;;  %s2412_s4 = inlined_call_operand.vmem [shape: bf16[2,96,32], index: 4, kind: input, shape index: {}]   ;;  %s2413_s5 = inlined_call_operand.vmem [shape: f32[2,96,1], index: 5, kind: input, shape index: {}]   ;;  %s2414_s6 = inlined_call_operand.vmem [shape: bf16[2,32,32], index: 6, kind: input, shape index: {}]   ;;  %s2415_s7 = inlined_call_operand.vmem [shape: f32[2,1,32], index: 7, kind: input, shape index: {}]   ;;  %s2416_s8 = inlined_call_operand.vmem [shape: f32[2,1,32], index: 8, kind: input, shape index: {}]   ;;  %s2417_s9 = inlined_call_operand.vmem [shape: f32[2,1,32], index: 9, kind: input, shape index: {}]   ;;  %s2418_s10 = inlined_call_operand.vmem [shape: bf16[2,32,128], index: 10, kind: input, shape index: {}]   ;;  %s2419_s11 = inlined_call_operand.vmem [shape: f32[2,1,128], index: 11, kind: input, shape index: {}]   ;;  %s2420_s12 = inlined_call_operand.vmem [shape: bf16[2,128,32], index: 12, kind: input, shape index: {}]   ;;  %s2421_s13 = inlined_call_operand.vmem [shape: f32[2,1,32], index: 13, kind: input, shape index: {}]   ;;  %s2422_s14 = inlined_call_operand.vmem [shape: f32[1,32], index: 14, kind: input, shape index: {}]   ;;  %s2423_s15 = inlined_call_operand.vmem [shape: f32[1,32], index: 15, kind: input, shape index: {}]   ;;  %s2424_s16 = inlined_call_operand.vmem [shape: f32[16,32], index: 16, kind: output, shape index: {}]  }
   0x1   :  { %2431 = sst [smem:[#allocation9_spill]] %s2408_s0  ;;  %s2128_s23 = smov 0  }
   0x2   :  { %2432 = sst [smem:[#allocation10_spill]] %s2409_s1 }
   0x3   :  { %2433 = sst [smem:[#allocation11_spill]] %s2412_s4 }
   0x4   :  { %2434 = sst [smem:[#allocation12_spill]] %s2414_s6 }
   0x5   :  { %2435 = sst [smem:[#allocation13_spill]] %s2422_s14 }
   0x6   :  { %2436 = sst [smem:[#allocation14_spill]] %s2423_s15 }
   0x7   :  { %2437 = sst [smem:[#allocation15_spill]] %s2424_s16 }
   0x8 LB: > { %2438 = sst [smem:[#allocation5_spill]] %s2024_s22  ;;  %s35_s24 = sadd.s32 1, %s2024_s22  ;;  %s2028_s23 = sphi %s2128_s23, %s26_s23   ;;  %s2024_s22 = sphi %s2126_s22, %s2457_s22   ;;  %s2020_s21 = sphi %s2124_s21, %s2456_s21  }
   0x9   : > { %2439 = sst [smem:[#allocation6_spill]] %s2028_s23  ;;  %p1766_p0 = scmp.ge.s32.totalorder %s2028_s23, 1 }
   0xa   : > { %p36_p1 = scmp.ge.s32.totalorder %s35_s24, 2  ;;  %p581_p2 = scmp.lt.s32.totalorder %s2028_s23, 3 }
   0xc   : > { %s2459_s24 = smov (%p36_p1, %s35_s24), 0  ;;  %p582_p3 = pnand %p1766_p0, %p581_p2 }
   0xd   : > { %2440 = sst [smem:[#allocation7_spill]] %s2459_s24 }
   0xe   : > { %585 = sbr.rel (%p582_p3) target bundleno = 2876 (0xb3c), region = 84 }
  0x15   : > { %p683_p4 = scmp.lt.s32.totalorder %s2020_s21, 1  ;;  %s2441_s6 = sld [smem:[#allocation12_spill]] }
  0x16   : > { %s2443_s4 = sld [smem:[#allocation11_spill]]  ;;  %p1775_p5 = scmp.ne.s32.totalorder %s2020_s21, 0 }
  0x17   : > { %s2146_s25 = scalar_select %p683_p4, %s2020_s21, 1 }
  0x18   : > { %s2444_s22 = sld [smem:[#allocation9_spill]] (!%p1775_p5)  ;;  %vm742_vm0 = vcmask (!%p1775_p5), 261120  }
  0x19   : > { %s1918_s17 = smul.u32 48, %s2146_s25  ;;  %s1823_s18 = sshll.u32 %s2146_s25, 4 }
  0x1a   : > { %s1919_s19 = smul.u32 96, %s2146_s25  ;;  %s709_s20 = scalar_lea.vmem %s2416_s8, %s2146_s25 }
  0x1b   : > { %s2162_s27 = scalar_lea.vmem %s2441_s6, %s1823_s18  ;;  %s720_s28 = scalar_lea.vmem %s2419_s11, %s2146_s25 }
  0x1c   : > { %2442 = sst [smem:[#allocation8_spill]] %s2162_s27  ;;  %s2167_s23 = scalar_lea.vmem %s2443_s4, %s1918_s17 }
  0x1d   : > { %s2176_s30 = scalar_lea.vmem %s2413_s5, %s1919_s19  ;;  %s712_s27 = scalar_lea.vmem %s2417_s9, %s2146_s25 }
  0x1e   : > { %s2189_s17 = scalar_lea.vmem %s2418_s10, %s1823_s18  ;;  %s1825_s14 = sshll.u32 %s2146_s25, 6  ;;  %v740_v0 = vld [vmem:[%s2444_s22] sm:$0xff] (!%p1775_p5) }
  0x1f   : > { %s2199_s4 = scalar_lea.vmem %s2420_s12, %s1825_s14  ;;  %s728_s6 = scalar_lea.vmem %s2421_s13, %s2146_s25  ;;  %743 = vst.msk [vmem:[#allocation2] sm:$0xff] (!%p1775_p5), %vm742_vm0, %v740_v0 }
  0x20   : > { %739 = sbr.rel (%p1775_p5) target bundleno = 39 (0x27), region = 88  ;;  %s2445_s24 = smov (!%p1775_p5), %s2444_s22 }
  0x21   : > { %v741_v1 = vld [vmem:[%s2445_s24 + $0x8] sm:$0xff] (!%p1775_p5) }
  0x22   : > { %744 = vst.msk [vmem:[#allocation2 + $0x8] sm:$0xff] (!%p1775_p5), %vm742_vm0, %v741_v1 }
  0x27 PF: > { %v745_v2 = vld [vmem:[#allocation2] sm:$0xff]  ;;  %vm749_vm1 = vcmask 261120   ;;  %v1960_v16 = vld [vmem:[%s2167_s23] sm:$0xff]   ;;  %v807_v18 = vld [vmem:[%s2176_s30 + $0x8] sm:$0xff]  ;;  %v2034_v19 = vmov 0   ;;  %s2446_s29 = scalar_lea.vmem %s2410_s2, %s2146_s25  ;;  %s2447_s0 = scalar_lea.vmem %s2411_s3, %s2146_s25  ;;  %vm1010_vm2 = vcmask 130048  }
  0x28   : > { %v750_v4 = vsel %vm749_vm1, %v745_v2, 0.0  ;;  %v1961_v17 = vld [vmem:[%s2167_s23 + $0x10] sm:$0xff]   ;;  %1854 = vmatprep.mubr.msk.bf16.mxu0 %vm749_vm1, %v1960_v16  ;;  %1959 = vset.pattern.permute.xlu1 %v2034_v19  ;;  %v806_v21 = vld [vmem:[%s2176_s30] sm:$0xff]  ;;  %v815_v22 = vld [vmem:[%s2176_s30 + $0x48] sm:$0xff]  ;;  %s2448_s22 = sld [smem:[#allocation10_spill]] }
  0x29   : > { %v746_v3 = vld [vmem:[#allocation2 + $0x8] sm:$0xff]  ;;  %751 = vadd.xlane.f32.xlu0 %v750_v4  ;;  %1858 = vmatprep.mubr.msk.bf16.mxu1 %vm749_vm1, %v1961_v17  ;;  %v808_v20 = vld [vmem:[%s2176_s30 + $0x10] sm:$0xff]  ;;  %v810_v25 = vld [vmem:[%s2176_s30 + $0x20] sm:$0xff] }
  0x2a   : > { %v753_v5 = vsel %vm749_vm1, %v746_v3, 0.0  ;;  %1958 = vset.pattern.permute.xlu0 %v2034_v19  ;;  %v809_v23 = vld [vmem:[%s2176_s30 + $0x18] sm:$0xff]  ;;  %v811_v26 = vld [vmem:[%s2176_s30 + $0x28] sm:$0xff]  ;;  %v812_v27 = vld [vmem:[%s2176_s30 + $0x30] sm:$0xff] }
  0x2b   : > { %v817_v24 = vld [vmem:[%s2176_s30 + $0x58] sm:$0xff]  ;;  %v814_v29 = vld [vmem:[%s2176_s30 + $0x40] sm:$0xff]  ;;  %v816_v30 = vld [vmem:[%s2176_s30 + $0x50] sm:$0xff] }
  0x2c   : > { %v813_v28 = vld [vmem:[%s2176_s30 + $0x38] sm:$0xff]  ;;  %v1776_v39 = vld [vmem:[%s2446_s29] ss:$0 sm:$0xff]  ;;  %v1962_v49 = vld [vmem:[%s2167_s23 + $0x8] sm:$0xff]  }
  0x2d   : > { %754 = vadd.xlane.f32.xlu0 %v753_v5  ;;  %v1777_v43 = vld [vmem:[%s2447_s0] ss:$0 sm:$0xff]  ;;  %v1963_v50 = vld [vmem:[%s2167_s23 + $0x18] sm:$0xff]   ;;  %v1965_v52 = vld [vmem:[%s2167_s23 + $0x28] sm:$0xff]  }
  0x2e   : > { %v1964_v51 = vld [vmem:[%s2167_s23 + $0x20] sm:$0xff]   ;;  %s2449_s15 = smov %s2448_s22  ;;  %s2281_s23 = smov 0  }
  0x2f   : > { %v2262_v53 = vld [vmem:[%s2448_s22] sm:$0xff]  ;;  %v2267_v54 = vld [vmem:[%s2449_s15 + $0x8] sm:$0xff] }
  0x43   : > { %820 = vperm.xlu0 %1958, %v806_v21  }
  0x47   : > { %865 = vperm.xlu0 %1958, %v815_v22  }
  0x4b   : > { %875 = vperm.xlu0 %1958, %v817_v24  }
  0xb6   : > { %v752_v6 = vpop.xlane.xlu0 %751 }
  0xb7   : > { %v757_v7 = vmul.f32 0.03125, %v752_v6 }
  0xb9   : > { %v759_v8 = vsub.f32 %v745_v2, %v757_v7 }
  0xba   : > { %v755_v9 = vpop.xlane.xlu0 %754 }
  0xbb   : > { %v758_v10 = vmul.f32 0.03125, %v755_v9  ;;  %v761_v11 = vmul.f32 %v759_v8, %v759_v8 }
  0xbd   : > { %v760_v12 = vsub.f32 %v746_v3, %v758_v10  ;;  %v763_v13 = vsel %vm749_vm1, %v761_v11, 0.0 }
  0xbe   : > { %764 = vadd.xlane.f32.xlu1 %v763_v13 }
  0xbf   : > { %v762_v14 = vmul.f32 %v760_v12, %v760_v12 }
  0xc1   : > { %v766_v15 = vsel %vm749_vm1, %v762_v14, 0.0 }
  0xc2   : > { %767 = vadd.xlane.f32.xlu1 %v766_v15  ;;  %v821_v62 = vpop.permute.xlu0 %820 }
  0xc6   : > { %v866_v14 = vpop.permute.xlu0 %865 }
  0xca   : > { %v876_v21 = vpop.permute.xlu0 %875 }
  0xd3   : > { %825 = vperm.xlu1 %1959, %v807_v18  }
  0xd7   : > { %830 = vperm.xlu1 %1959, %v808_v20  }
  0xdb   : > { %835 = vperm.xlu1 %1959, %v809_v23  }
  0xdf   : > { %840 = vperm.xlu1 %1959, %v810_v25  }
  0xe3   : > { %845 = vperm.xlu1 %1959, %v811_v26  }
  0xe7   : > { %850 = vperm.xlu1 %1959, %v812_v27  }
  0xeb   : > { %855 = vperm.xlu1 %1959, %v813_v28  }
  0xef   : > { %860 = vperm.xlu1 %1959, %v814_v29  }
  0xf3   : > { %870 = vperm.xlu1 %1959, %v816_v30  }
 0x14b   : > { %v765_v31 = vpop.xlane.xlu1 %764 }
 0x14c   : > { %v769_v32 = vmul.f32 0.03125, %v765_v31 }
 0x14e   : > { %v771_v33 = vadd.f32 1e-05, %v769_v32 }
 0x14f   : > { %v768_v34 = vpop.xlane.xlu1 %767 }
 0x150   : > { %1966 = vrsqrt.f32 %v771_v33  ;;  %v770_v35 = vmul.f32 0.03125, %v768_v34 }
 0x152   : > { %v772_v36 = vadd.f32 1e-05, %v770_v35 }
 0x153   : > { %v826_v55 = vpop.permute.xlu1 %825 }
 0x154   : > { %1968 = vrsqrt.f32 %v772_v36 }
 0x157   : > { %v831_v56 = vpop.permute.xlu1 %830 }
 0x15a   : > { %v1967_v37 = vpop.eup %1966 }
 0x15b   : > { %v775_v38 = vmul.f32 %v1967_v37, %v759_v8  ;;  %v836_v57 = vpop.permute.xlu1 %835 }
 0x15d   : > { %v783_v42 = vmul.f32 %v1776_v39, %v775_v38 }
 0x15e   : > { %v1969_v40 = vpop.eup %1968 }
 0x15f   : > { %v776_v41 = vmul.f32 %v1969_v40, %v760_v12  ;;  %v2242_v45 = vadd.f32 %v1777_v43, %v783_v42  ;;  %v841_v58 = vpop.permute.xlu1 %840 }
 0x161   : > { %v784_v44 = vmul.f32 %v1776_v39, %v776_v41 }
 0x163   : > { %v2244_v46 = vadd.f32 %v1777_v43, %v784_v44  ;;  %v846_v59 = vpop.permute.xlu1 %845 }
 0x165   : > { %v793_v47 = vpack.c.bf16 %v2244_v46, %v2242_v45 }
 0x167   : > { %1916 = vmatprep.subr.msk.bf16.mxu0 %vm749_vm1, %v793_v47  ;;  %1917 = vmatprep.subr.msk.bf16.mxu1 %vm749_vm1, %v793_v47  ;;  %v927_v48 = vsel %vm749_vm1, %v793_v47, 0  ;;  %v851_v60 = vpop.permute.xlu1 %850 }
 0x168   : > { %1853 = vmatpush3.bf16.xpose.msra.mxu0 %v927_v48  ;;  %1915 = vmatpush3.bf16.xpose.msra.mxu1 %v927_v48 }
 0x16b   : > { %v856_v61 = vpop.permute.xlu1 %855 }
 0x16f   : > { %1855 = vmatmul.mubr.msk.bf16.vlgmr.msra.gmra.mrb[0].mxu0 %vm749_vm1, %v1962_v49  ;;  %1859 = vmatmul.mubr.msk.bf16.vlgmr.msra.gmra.mrb[0].mxu1 %vm749_vm1, %v1963_v50  ;;  %v861_v63 = vpop.permute.xlu1 %860 }
 0x170   : > { %1862 = vmatprep.mubr.msk.bf16.mxu1 %vm749_vm1, %v1964_v51 }
 0x173   : > { %v871_v17 = vpop.permute.xlu1 %870 }
 0x177   : > { %1863 = vmatmul.mubr.msk.bf16.gmra.mrb[4].mxu1 %vm749_vm1, %v1965_v52 }
 0x242   : > { %v1856_v0 = vpop.f32.mrb[0].mxu0  ;;  %v1860_v1 = vpop.f32.mrb[0].mxu1 }
 0x243   : > { %v972_v2 = vadd.f32 %v1856_v0, %v831_v56  ;;  %v988_v3 = vadd.f32 %v1860_v1, %v851_v60  ;;  %v963_v4 = vpop.f32.mrb[1].mxu0  ;;  %v979_v5 = vpop.f32.mrb[1].mxu1 }
 0x244   : > { %v964_v6 = vadd.f32 %v963_v4, %v821_v62  ;;  %v980_v7 = vadd.f32 %v979_v5, %v841_v58  ;;  %v1857_v8 = vpop.f32.mrb[2].mxu0  ;;  %v1861_v9 = vpop.f32.mrb[2].mxu1 }
 0x245   : > { %1013 = vst.msk [vmem:[#allocation3 + $0x10] sm:$0xff] %vm1010_vm2, %v972_v2  ;;  %1017 = vst.msk [vmem:[#allocation3 + $0x30] sm:$0xff] %vm1010_vm2, %v988_v3  ;;  %v975_v10 = vadd.f32 %v1857_v8, %v836_v57  ;;  %v991_v11 = vadd.f32 %v1861_v9, %v856_v61  ;;  %v966_v12 = vpop.f32.mrb[3].mxu0  ;;  %v982_v13 = vpop.f32.mrb[3].mxu1 }
 0x246   : > { %1011 = vst.msk [vmem:[#allocation3] sm:$0xff] %vm1010_vm2, %v964_v6  ;;  %1015 = vst.msk [vmem:[#allocation3 + $0x20] sm:$0xff] %vm1010_vm2, %v980_v7  ;;  %v967_v15 = vadd.f32 %v966_v12, %v826_v55  ;;  %v983_v16 = vadd.f32 %v982_v13, %v846_v59 }
 0x247   : > { %1014 = vst.msk [vmem:[#allocation3 + $0x18] sm:$0xff] %vm1010_vm2, %v975_v10  ;;  %1018 = vst.msk [vmem:[#allocation3 + $0x38] sm:$0xff] %vm1010_vm2, %v991_v11 }
 0x248   : > { %1012 = vst.msk [vmem:[#allocation3 + $0x8] sm:$0xff] %vm1010_vm2, %v967_v15  ;;  %1016 = vst.msk [vmem:[#allocation3 + $0x28] sm:$0xff] %vm1010_vm2, %v983_v16 }
 0x24a   : > { %v1864_v18 = vpop.f32.mrb[4].mxu1 }
 0x24b   : > { %v1004_v19 = vadd.f32 %v1864_v18, %v871_v17  ;;  %v995_v20 = vpop.f32.mrb[5].mxu1 }
 0x24c   : > { %v996_v22 = vadd.f32 %v995_v20, %v861_v63  ;;  %v1865_v23 = vpop.f32.mrb[6].mxu1 }
 0x24d   : > { %1021 = vst.msk [vmem:[#allocation3 + $0x50] sm:$0xff] %vm1010_vm2, %v1004_v19  ;;  %v1007_v24 = vadd.f32 %v1865_v23, %v876_v21  ;;  %v998_v25 = vpop.f32.mrb[7].mxu1 }
 0x24e   : > { %1019 = vst.msk [vmem:[#allocation3 + $0x40] sm:$0xff] %vm1010_vm2, %v996_v22  ;;  %v999_v26 = vadd.f32 %v998_v25, %v866_v14 }
 0x24f   : > { %1022 = vst.msk [vmem:[#allocation3 + $0x58] sm:$0xff] %vm1010_vm2, %v1007_v24 }
 0x250   : > { %1020 = vst.msk [vmem:[#allocation3 + $0x48] sm:$0xff] %vm1010_vm2, %v999_v26 }
 0x251 LB: >> { %v2035_v27 = vmov 0.0   ;;  %vm2036_vm3 = vmmov 0   ;;  %s1790_s19 = sshll.u32 %s2032_s23, 3  ;;  %vm1063_vm4 = vcmask 1043456   ;;  %vm1059_vm5 = vcmask 64512   ;;  %s1030_s23 = sadd.s32 1, %s2032_s23   ;;  %s2032_s23 = sphi %s2281_s23, %s1030_s23  }
 0x252   : >> { %1866 = vmatprep.subr.bf16.mxu0 %v2035_v27  ;;  %1868 = vmatprep.mubr.msk.bf16.mxu0 %vm2036_vm3, %v2035_v27  ;;  %s2289_s29 = scalar_lea.vmem [#allocation3], %s1790_s19  ;;  %s1177_s30 = scalar_lea.vmem [#allocation4], %s1790_s19 }
 0x253   : >> { %1872 = vmatprep.subr.bf16.mxu1 %v2035_v27  ;;  %1874 = vmatprep.mubr.msk.bf16.mxu1 %vm2036_vm3, %v2035_v27  ;;  %p1027_p6 = scmp.ge.s32.totalorder %s1030_s23, 4  }
 0x254   : > { %s2450_s1 = sld [smem:[#allocation8_spill]] (%p1027_p6)  ;;  %v2037_v11 = vmov (%p1027_p6), 0.0   ;;  %vm2038_vm6 = vmmov (%p1027_p6), 0   ;;  %s2451_s18 = scalar_lea.vmem (%p1027_p6), %s2415_s7, %s2146_s25 }
 0x255   : > { %v1797_v14 = vld [vmem:[%s2451_s18] ss:$0 sm:$0xff] (%p1027_p6)  ;;  %p1816_p7 = scmp.ne.s32.totalorder (%p1027_p6), %s2020_s21, 1 }
 0x257   : >> { %v1033_v28 = vld [vmem:[%s2289_s29] sm:$0xff] }
 0x258   : >> { %v1792_v29 = vld [vmem:[%s2289_s29 + $0x20] sm:$0xff]  ;;  %v1034_v30 = vpack.c.bf16 %v1033_v28, %v1033_v28 }
 0x259   : >> { %v1038_v31 = vpack.c.bf16 %v1792_v29, %v1792_v29  ;;  %v1794_v0 = vld [vmem:[%s2289_s29 + $0x40] sm:$0xff] }
 0x25a   : >> { %1043 = vxpose.xlu0.c.b16.start.end [1/1] (short) (narrow) %v1034_v30, 16  ;;  %v1042_v1 = vpack.c.bf16 %v1794_v0, %v1794_v0  ;;  %v1978_v12 = vld [vmem:[%s2450_s1] sm:$0xff] (%p1027_p6)  }
 0x25b   : >> { %v1065_v32 = vsel %vm1063_vm4, %v1038_v31, 0  ;;  %v1803_v0 = vld [vmem:[%s720_s28] ss:$0 sm:$0xff] (%p1027_p6) }
 0x25c   : >> { %1867 = vmatpush3.bf16.msra.mxu0 %v1065_v32 }
 0x25d   : > { %1894 = vmatprep.subr.bf16.mxu0 (%p1027_p6), %v2037_v11 }
 0x2c0   : >> { %v1051_v33 = vpop.trf.xlu0 }
 0x2c1   : >> { %1869 = vmatmul.mubr.msk.bf16.vlgmr.msra.gmra.mrb[0].mxu0 %vm1059_vm5, %v1051_v33  ;;  %v1980_v33 = vld [vmem:[%s2189_s17] sm:$0xff] (%p1027_p6)  }
 0x2c2   : > { %1910 = vmatprep.mubr.msk.bf16.mxu0 (%p1027_p6), %vm2038_vm6, %v2037_v11 }
 0x394   : >> { %v1101_v34 = vpop.f32.mrb[0].mxu0 }
 0x395   : >> { %v1102_v35 = vadd.f32 %v1101_v34, %v2262_v53  ;;  %v1870_v36 = vpop.f32.mrb[1].mxu0  ;;  %v1981_v34 = vld [vmem:[%s2189_s17 + $0x8] sm:$0xff] (%p1027_p6)  }
 0x396   : >> { %v1104_v37 = vpop.f32.mrb[2].mxu0  ;;  %v1983_v36 = vld [vmem:[%s2199_s4 + $0x8] sm:$0xff] (%p1027_p6)  }
 0x397   : >> { %v1105_v38 = vadd.f32 %v1104_v37, %v2267_v54  ;;  %v1871_v39 = vpop.f32.mrb[3].mxu0  ;;  %v1108_v40 = vsel %vm1010_vm2, %v1102_v35, -inf  ;;  %v1979_v54 = vld [vmem:[%s2450_s1 + $0x8] sm:$0xff] (%p1027_p6)  }
 0x398   : >> { %1109 = vmax.xlane.f32.xlu0 %v1108_v40 }
 0x399   : >> { %v1111_v41 = vsel %vm1010_vm2, %v1105_v38, -inf }
 0x39a   : >> { %1112 = vmax.xlane.f32.xlu1 %v1111_v41 }
 0x425   : >> { %v1110_v42 = vpop.xlane.xlu0 %1109 }
 0x426   : >> { %v1114_v43 = vsub.f32 %v1102_v35, %v1110_v42  ;;  %v1982_v35 = vld [vmem:[%s2199_s4] sm:$0xff] (%p1027_p6)  }
 0x427   : >> { %v1113_v44 = vpop.xlane.xlu1 %1112  ;;  %1895 = vmatpush3.bf16.msra.mxu0 (%p1027_p6), %v1982_v35 }
 0x428   : >> { %v1116_v47 = vmul.f32 1.442695, %v1114_v43  ;;  %v1115_v48 = vsub.f32 %v1105_v38, %v1113_v44  ;;  %1896 = vmatprep.subr.bf16.mxu0 (%p1027_p6), %v2037_v11 }
 0x42a   : >> { %1970 = vpow2.f32 %v1116_v47  ;;  %v1118_v49 = vmul.f32 1.442695, %v1115_v48  ;;  %v1801_v47 = vld [vmem:[%s709_s20] ss:$0 sm:$0xff] (%p1027_p6) }
 0x42b   : > { %1897 = vmatpush3.bf16.msra.mxu0 (%p1027_p6), %v1983_v36 }
 0x42c   : >> { %1972 = vpow2.f32 %v1118_v49  ;;  %1898 = vmatprep.subr.bf16.mxu0 (%p1027_p6), %v2037_v11 }
 0x434   : >> { %v1971_v50 = vpop.eup %1970 }
 0x435   : >> { %v1120_v51 = vsel %vm1010_vm2, %v1971_v50, 0.0 }
 0x436   : >> { %v1973_v52 = vpop.eup %1972  ;;  %1121 = vadd.xlane.f32.xlu1 %v1120_v51  ;;  %v1802_v51 = vld [vmem:[%s712_s27] ss:$0 sm:$0xff] (%p1027_p6) }
 0x437   : >> { %v1123_v55 = vsel %vm1010_vm2, %v1973_v52, 0.0 }
 0x43a   : >> { %1124 = vadd.xlane.f32.xlu1 %v1123_v55 }
 0x4c3   : >> { %v1122_v56 = vpop.xlane.xlu1 %1121 }
 0x4c4   : >> { %1974 = vrcp.f32 %v1122_v56 }
 0x4c7   : >> { %v1125_v57 = vpop.xlane.xlu1 %1124 }
 0x4c8   : >> { %1976 = vrcp.f32 %v1125_v57 }
 0x4ce   : >> { %v1975_v58 = vpop.eup %1974 }
 0x4cf   : >> { %v1128_v60 = vmul.f32 %v1975_v58, %v1971_v50  ;;  %v1984_v58 = vld [vmem:[%s2199_s4 + $0x10] sm:$0xff] (%p1027_p6)  }
 0x4d0   : > { %1899 = vmatpush3.bf16.msra.mxu0 (%p1027_p6), %v1984_v58 }
 0x4d1   : > { %1900 = vmatprep.subr.bf16.mxu0 (%p1027_p6), %v2037_v11 }
 0x4d2   : >> { %v1977_v59 = vpop.eup %1976 }
 0x4d3   : >> { %v1129_v61 = vmul.f32 %v1977_v59, %v1973_v52  ;;  %v1985_v59 = vld [vmem:[%s2199_s4 + $0x18] sm:$0xff] (%p1027_p6)  }
 0x4d4   : > { %1901 = vmatpush3.bf16.msra.mxu0 (%p1027_p6), %v1985_v59 }
 0x4d5   : >> { %v1130_v62 = vpack.c.bf16 %v1129_v61, %v1128_v60  ;;  %1902 = vmatprep.subr.bf16.mxu0 (%p1027_p6), %v2037_v11  ;;  %v1986_v60 = vld [vmem:[%s2199_s4 + $0x20] sm:$0xff] (%p1027_p6)   ;;  %v1987_v61 = vld [vmem:[%s2199_s4 + $0x28] sm:$0xff] (%p1027_p6)  }
 0x4d7   : >> { %v1135_v63 = vsel %vm1010_vm2, %v1130_v62, 0  ;;  %v1988_v62 = vld [vmem:[%s2199_s4 + $0x30] sm:$0xff] (%p1027_p6)  }
 0x4d8   : >> { %1873 = vmatpush3.bf16.xpose.msra.mxu1 %v1135_v63  ;;  %1903 = vmatpush3.bf16.msra.mxu0 (%p1027_p6), %v1986_v60  ;;  %v1989_v63 = vld [vmem:[%s2199_s4 + $0x38] sm:$0xff] (%p1027_p6)  }
 0x4d9   : > { %1878 = vmatprep.subr.bf16.mxu1 (%p1027_p6), %v2037_v11  ;;  %1904 = vmatprep.subr.bf16.mxu0 (%p1027_p6), %v2037_v11 }
 0x4dc   : > { %1905 = vmatpush3.bf16.msra.mxu0 (%p1027_p6), %v1987_v61 }
 0x4dd   : > { %1906 = vmatprep.subr.bf16.mxu0 (%p1027_p6), %v2037_v11 }
 0x4df   : >> { %1875 = vmatmul.mubr.msk.bf16.vlgmr.msra.gmra.mrb[0].mxu1 %vm1010_vm2, %v1042_v1 }
 0x4e0   : > { %1882 = vmatprep.mubr.msk.bf16.mxu1 (%p1027_p6), %vm2038_vm6, %v2037_v11  ;;  %1879 = vmatpush3.bf16.msra.mxu1 (%p1027_p6), %v1978_v12 }
 0x4e1   : > { %1880 = vmatprep.subr.bf16.mxu1 (%p1027_p6), %v2037_v11  ;;  %1907 = vmatpush3.bf16.msra.mxu0 (%p1027_p6), %v1988_v62 }
 0x4e2   : > { %1908 = vmatprep.subr.bf16.mxu0 (%p1027_p6), %v2037_v11 }
 0x4e4   : > { %1881 = vmatpush3.bf16.msra.mxu1 (%p1027_p6), %v1979_v54 }
 0x4e5   : > { %1886 = vmatprep.subr.bf16.mxu1 (%p1027_p6), %v2037_v11  ;;  %1909 = vmatpush3.bf16.msra.mxu0 (%p1027_p6), %v1989_v63 }
 0x5af   : > { %1029 = sbr.rel (!%p1027_p6) target bundleno = 593 (0x251), region = 169 }
 0x5b2   : >> { %v1171_v2 = vpop.f32.mrb[0].mxu1 }
 0x5b3   : >> { %1178 = vst.msk [vmem:[%s1177_s30] sm:$0xff] %vm1010_vm2, %v1171_v2  ;;  %v1876_v3 = vpop.f32.mrb[1].mxu1 }
 0x5b4   : >> { %v1174_v4 = vpop.f32.mrb[2].mxu1 }
 0x5b5   : >> { %v1877_v5 = vpop.f32.mrb[3].mxu1 }
 0x5b6   : > { %s2453_s29 = sld [smem:[#allocation14_spill]] (!%p1816_p7)  ;;  %s2454_s0 = sld [smem:[#allocation15_spill]] (!%p1816_p7) }
 0x5ba   : > { %v1179_v6 = vld [vmem:[#allocation4] sm:$0xff]  ;;  %v1180_v7 = vld [vmem:[#allocation4 + $0x8] sm:$0xff]  ;;  %v1181_v8 = vld [vmem:[#allocation4 + $0x10] sm:$0xff] }
 0x5bb   : > { %v1183_v9 = vpack.c.bf16 %v1180_v7, %v1179_v6  ;;  %v1182_v10 = vld [vmem:[#allocation4 + $0x18] sm:$0xff] }
 0x5bc   : > { %v1184_v53 = vpack.c.bf16 %v1182_v10, %v1181_v8 }
 0x5bd   : > { %1196 = vxpose.xlu0.c.b16.start [1/2] (short) (narrow) %v1183_v9, 16 }
 0x5c1   : > { %1197 = vxpose.xlu0.c.b16.end [2/2] (short) (narrow) %v1184_v53, 16 }
 0x623   : > { %v1204_v13 = vpop.trf.xlu0 }
 0x624   : > { %1883 = vmatmul.mubr.msk.bf16.vlgmr.msra.gmra.mrb[0].mxu1 %vm749_vm1, %v1204_v13 }
 0x625   : > { %1890 = vmatprep.mubr.msk.bf16.mxu1 %vm2038_vm6, %v2037_v11  ;;  %1887 = vmatpush3.bf16.msra.mxu1 %v1980_v33 }
 0x626   : > { %1888 = vmatprep.subr.bf16.mxu1 %v2037_v11 }
 0x629   : > { %1889 = vmatpush3.bf16.msra.mxu1 %v1981_v34 }
 0x6f7   : > { %v1261_v15 = vpop.f32.mrb[0].mxu1 }
 0x6f8   : > { %v1262_v16 = vadd.f32 %v1797_v14, %v1261_v15  ;;  %v1884_v17 = vpop.f32.mrb[1].mxu1 }
 0x6f9   : > { %v1264_v18 = vpop.f32.mrb[2].mxu1 }
 0x6fa   : > { %v2324_v19 = vadd.f32 %v1262_v16, %v2242_v45  ;;  %v1265_v20 = vadd.f32 %v1797_v14, %v1264_v18  ;;  %v1885_v21 = vpop.f32.mrb[3].mxu1  ;;  %v1807_v16 = vld [vmem:[%s728_s6] ss:$0 sm:$0xff]  ;;  %s2452_s6 = sld [smem:[#allocation13_spill]] (!%p1816_p7) }
 0x6fc   : > { %v2327_v22 = vadd.f32 %v1265_v20, %v2244_v46  ;;  %v1272_v23 = vsel %vm749_vm1, %v2324_v19, 0.0 }
 0x6fd   : > { %1273 = vadd.xlane.f32.xlu1 %v1272_v23 }
 0x6fe   : > { %v1275_v24 = vsel %vm749_vm1, %v2327_v22, 0.0 }
 0x701   : > { %1276 = vadd.xlane.f32.xlu1 %v1275_v24 }
 0x78a   : > { %v1274_v25 = vpop.xlane.xlu1 %1273 }
 0x78b   : > { %v1278_v26 = vmul.f32 0.03125, %v1274_v25 }
 0x78d   : > { %v1280_v45 = vsub.f32 %v2324_v19, %v1278_v26 }
 0x78e   : > { %v1277_v27 = vpop.xlane.xlu1 %1276 }
 0x78f   : > { %v1279_v28 = vmul.f32 0.03125, %v1277_v27  ;;  %v1282_v46 = vmul.f32 %v1280_v45, %v1280_v45 }
 0x791   : > { %v1281_v29 = vsub.f32 %v2327_v22, %v1279_v28  ;;  %v1284_v30 = vsel %vm749_vm1, %v1282_v46, 0.0 }
 0x792   : > { %1285 = vadd.xlane.f32.xlu0 %v1284_v30 }
 0x793   : > { %v1283_v31 = vmul.f32 %v1281_v29, %v1281_v29 }
 0x795   : > { %v1287_v32 = vsel %vm749_vm1, %v1283_v31, 0.0 }
 0x796   : > { %1288 = vadd.xlane.f32.xlu1 %v1287_v32 }
 0x81f   : > { %v1286_v37 = vpop.xlane.xlu0 %1285 }
 0x820   : > { %v1290_v38 = vmul.f32 0.03125, %v1286_v37 }
 0x822   : > { %v1292_v39 = vadd.f32 1e-05, %v1290_v38 }
 0x823   : > { %v1289_v40 = vpop.xlane.xlu1 %1288 }
 0x824   : > { %1990 = vrsqrt.f32 %v1292_v39  ;;  %v1291_v41 = vmul.f32 0.03125, %v1289_v40 }
 0x826   : > { %v1293_v42 = vadd.f32 1e-05, %v1291_v41 }
 0x828   : > { %1992 = vrsqrt.f32 %v1293_v42  ;;  %v1817_v42 = vld [vmem:[%s2452_s6] ss:$0 sm:$0xff] (!%p1816_p7) }
 0x82e   : > { %v1991_v43 = vpop.eup %1990 }
 0x82f   : > { %v1296_v44 = vmul.f32 %v1991_v43, %v1280_v45 }
 0x831   : > { %v1304_v50 = vmul.f32 %v1801_v47, %v1296_v44  ;;  %v1818_v44 = vld [vmem:[%s2453_s29] ss:$0 sm:$0xff] (!%p1816_p7) }
 0x832   : > { %v1993_v48 = vpop.eup %1992 }
 0x833   : > { %v1297_v49 = vmul.f32 %v1993_v48, %v1281_v29  ;;  %v1312_v55 = vadd.f32 %v1802_v51, %v1304_v50 }
 0x835   : > { %v1305_v52 = vmul.f32 %v1801_v47, %v1297_v49 }
 0x837   : > { %v1313_v56 = vadd.f32 %v1802_v51, %v1305_v52 }
 0x839   : > { %v1318_v57 = vpack.c.bf16 %v1313_v56, %v1312_v55 }
 0x83b   : > { %1891 = vmatmul.mubr.msk.bf16.vlgmr.msra.gmra.mrb[4].mxu1 %vm749_vm1, %v1318_v57 }
 0x90e   : > { %v1375_v1 = vpop.f32.mrb[4].mxu1 }
 0x90f   : > { %v1376_v2 = vadd.f32 %v1803_v0, %v1375_v1  ;;  %v1892_v3 = vpop.f32.mrb[5].mxu1 }
 0x910   : > { %v1378_v4 = vpop.f32.mrb[6].mxu1 }
 0x911   : > { %v1384_v5 = vmul.f32 0.70710677, %v1376_v2  ;;  %v1379_v6 = vadd.f32 %v1803_v0, %v1378_v4  ;;  %v1893_v7 = vpop.f32.mrb[7].mxu1  ;;  %v1382_v12 = vmul.f32 0.5, %v1376_v2 }
 0x913   : > { %1994 = verf.f32 %v1384_v5  ;;  %v1385_v8 = vmul.f32 0.70710677, %v1379_v6  ;;  %v1383_v53 = vmul.f32 0.5, %v1379_v6 }
 0x915   : > { %1996 = verf.f32 %v1385_v8 }
 0x91d   : > { %v1995_v9 = vpop.eup %1994 }
 0x91e   : > { %v1388_v10 = vadd.f32 1.0, %v1995_v9 }
 0x91f   : > { %v1997_v11 = vpop.eup %1996 }
 0x920   : > { %v1389_v54 = vadd.f32 1.0, %v1997_v11  ;;  %v1390_v13 = vmul.f32 %v1388_v10, %v1382_v12 }
 0x922   : > { %v1391_v14 = vmul.f32 %v1389_v54, %v1383_v53 }
 0x924   : > { %v1408_v15 = vpack.c.bf16 %v1391_v14, %v1390_v13 }
 0x926   : > { %1911 = vmatmul.mubr.bf16.vlgmr.msra.gmra.mrb[0].mxu0 %v1408_v15 }
 0x9f9   : > { %v1498_v17 = vpop.f32.mrb[0].mxu0 }
 0x9fa   : > { %v1499_v18 = vadd.f32 %v1807_v16, %v1498_v17  ;;  %v1912_v20 = vpop.f32.mrb[1].mxu0  ;;  %1512 = sbr.rel (%p1816_p7) target bundleno = 2876 (0xb3c), region = 99 }
 0x9fb   : > { %v1501_v21 = vpop.f32.mrb[2].mxu0 }
 0x9fc   : > { %v1505_v23 = vadd.f32 %v1499_v18, %v2324_v19  ;;  %v1502_v24 = vadd.f32 %v1807_v16, %v1501_v21  ;;  %v1913_v25 = vpop.f32.mrb[3].mxu0 }
 0x9fe   : > { %1507 = vst.msk [vmem:[#allocation2] sm:$0xff] %vm749_vm1, %v1505_v23  ;;  %v1506_v26 = vadd.f32 %v1502_v24, %v2327_v22  ;;  %v1515_v45 = vsel (!%p1816_p7), %vm749_vm1, %v1505_v23, 0.0 }
 0x9ff   : > { %1516 = vadd.xlane.f32.xlu0 (!%p1816_p7), %v1515_v45 }
 0xa00   : > { %1508 = vst.msk [vmem:[#allocation2 + $0x8] sm:$0xff] %vm749_vm1, %v1506_v26  ;;  %v1518_v27 = vsel (!%p1816_p7), %vm749_vm1, %v1506_v26, 0.0 }
 0xa03   : > { %1519 = vadd.xlane.f32.xlu0 %v1518_v27 }
 0xa8c   : > { %v1517_v28 = vpop.xlane.xlu0 %1516 }
 0xa8d   : > { %v1521_v46 = vmul.f32 0.03125, %v1517_v28 }
 0xa8f   : > { %v1523_v19 = vsub.f32 %v1505_v23, %v1521_v46 }
 0xa90   : > { %v1520_v29 = vpop.xlane.xlu0 %1519 }
 0xa91   : > { %v1522_v30 = vmul.f32 0.03125, %v1520_v29  ;;  %v1525_v31 = vmul.f32 %v1523_v19, %v1523_v19 }
 0xa93   : > { %v1524_v32 = vsub.f32 %v1506_v26, %v1522_v30  ;;  %v1527_v22 = vsel %vm749_vm1, %v1525_v31, 0.0 }
 0xa94   : > { %1528 = vadd.xlane.f32.xlu1 %v1527_v22 }
 0xa95   : > { %v1526_v33 = vmul.f32 %v1524_v32, %v1524_v32 }
 0xa97   : > { %v1530_v34 = vsel %vm749_vm1, %v1526_v33, 0.0 }
 0xa98   : > { %1531 = vadd.xlane.f32.xlu1 %v1530_v34 }
 0xb21   : > { %v1529_v35 = vpop.xlane.xlu1 %1528 }
 0xb22   : > { %v1533_v36 = vmul.f32 0.03125, %v1529_v35 }
 0xb24   : > { %v1535_v37 = vadd.f32 1e-05, %v1533_v36 }
 0xb25   : > { %v1532_v38 = vpop.xlane.xlu1 %1531 }
 0xb26   : > { %1998 = vrsqrt.f32 %v1535_v37  ;;  %v1534_v39 = vmul.f32 0.03125, %v1532_v38 }
 0xb28   : > { %v1536_v40 = vadd.f32 1e-05, %v1534_v39 }
 0xb2a   : > { %2000 = vrsqrt.f32 %v1536_v40 }
 0xb30   : > { %v1999_v41 = vpop.eup %1998 }
 0xb31   : > { %v1539_v43 = vmul.f32 %v1999_v41, %v1523_v19 }
 0xb33   : > { %v1547_v47 = vmul.f32 %v1817_v42, %v1539_v43 }
 0xb34   : > { %v2001_v48 = vpop.eup %2000 }
 0xb35   : > { %v1555_v49 = vadd.f32 %v1818_v44, %v1547_v47  ;;  %v1540_v50 = vmul.f32 %v2001_v48, %v1524_v32 }
 0xb37   : > { %1557 = vst.msk [vmem:[%s2454_s0] sm:$0xff] %vm749_vm1, %v1555_v49  ;;  %v1548_v51 = vmul.f32 %v1817_v42, %v1540_v50 }
 0xb39   : > { %v1556_v52 = vadd.f32 %v1818_v44, %v1548_v51 }
 0xb3b   : > { %1558 = vst.msk [vmem:[%s2454_s0 + $0x8] sm:$0xff] %vm749_vm1, %v1556_v52 }
 0xb3c PF: > { %s2455_s17 = sld [smem:[#allocation6_spill]]  ;;  %s2456_s21 = sld [smem:[#allocation5_spill]] }
 0xb3d   : > { %s2457_s22 = sld [smem:[#allocation7_spill]] }
 0xb42   : > { %s26_s23 = sadd.s32 1, %s2455_s17  }
 0xb43   : > { %p23_p8 = scmp.ge.s32.totalorder %s26_s23, 4  }
 0xb45   :  { %25 = sbr.rel (!%p23_p8) target bundleno = 8 (0x8), region = 180 }

</bundles_post_ra>
